<compile_context>
chip_gen: v7x
topology: tpu7x:2x2x1
jax: 0.10.0
libtpu: 0.0.40
codegen_flags: <defaults>
</compile_context>

<pallas_src>
import numpy as np

import jax
import jax.numpy as jnp
from jax import lax
from jax.experimental import pallas as pl
from jax.experimental.pallas import tpu as pltpu


# ---------------------------------------------------------------------------
# Fused kernel: one image per grid step, everything in VMEM.
# ---------------------------------------------------------------------------

def _lenet_kernel(*refs):
    (x_ref,                                    # [1,1,32,32] input image
     k1_ref, b1r_ref,                          # conv1 banded weights / bias row
     rse28_ref, rso28_ref, cse1_ref, cso1_ref,  # pool1 selectors
     k2_ref, b2r_ref,                          # conv2 banded weights / bias row
     rse10_ref, rso10_ref, cse2_ref, cso2_ref,  # pool2 selectors
     a1fc_ref, b1f_ref,                        # fc1 (flatten folded in)
     w2f_ref, b2f_ref, w3f_ref, b3f_ref,       # fc2 / fc3 (padded to 128)
     out_ref) = refs

    f32 = jnp.float32
    xv = x_ref[0, 0]                                           # [32, 32] (h, w)

    # conv1 + bias + relu:  OUT1[oh, c*28+ow] = sum_i x[i:i+28,:] @ K1[i]
    acc1 = jnp.dot(xv[0:28, :], k1_ref[0], preferred_element_type=f32)
    for i in range(1, 5):
        acc1 = acc1 + jnp.dot(xv[i:i + 28, :], k1_ref[i],
                              preferred_element_type=f32)      # [28, 168]
    a1 = jnp.maximum(acc1 + b1r_ref[...], 0.0)

    # pool1 (2x2, stride 2) via exact 0/1 selection matmuls + max
    hm = jnp.maximum(jnp.dot(rse28_ref[...], a1, preferred_element_type=f32),
                     jnp.dot(rso28_ref[...], a1, preferred_element_type=f32))
    p1 = jnp.maximum(jnp.dot(hm, cse1_ref[...], preferred_element_type=f32),
                     jnp.dot(hm, cso1_ref[...], preferred_element_type=f32))
    # p1: [14, 6*14=84]

    # conv2 + bias + relu
    acc2 = jnp.dot(p1[0:10, :], k2_ref[0], preferred_element_type=f32)
    for i in range(1, 5):
        acc2 = acc2 + jnp.dot(p1[i:i + 10, :], k2_ref[i],
                              preferred_element_type=f32)      # [10, 160]
    a2 = jnp.maximum(acc2 + b2r_ref[...], 0.0)

    # pool2
    hm2 = jnp.maximum(jnp.dot(rse10_ref[...], a2, preferred_element_type=f32),
                      jnp.dot(rso10_ref[...], a2, preferred_element_type=f32))
    p2 = jnp.maximum(jnp.dot(hm2, cse2_ref[...], preferred_element_type=f32),
                     jnp.dot(hm2, cso2_ref[...], preferred_element_type=f32))
    # p2: [5, 16*5=80], rows = pooled height, lanes = channel*5 + pooled width

    # fc1: flatten is folded into 5 per-row matmuls against permuted weights
    y = jnp.dot(p2[0:1, :], a1fc_ref[0], preferred_element_type=f32)
    for h in range(1, 5):
        y = y + jnp.dot(p2[h:h + 1, :], a1fc_ref[h],
                        preferred_element_type=f32)            # [1, 128]
    y = jnp.maximum(y + b1f_ref[...], 0.0)

    # fc2 + relu, fc3 (all lane-padded to 128; padded lanes stay exactly 0)
    y = jnp.maximum(jnp.dot(y, w2f_ref[...], preferred_element_type=f32)
                    + b2f_ref[...], 0.0)
    y = jnp.dot(y, w3f_ref[...], preferred_element_type=f32) + b3f_ref[...]

    out_ref[0] = y                                             # [1, 128]


# ---------------------------------------------------------------------------
# Host-side (one-time) parameter preparation: banded conv matrices, pooling
# selection matrices, permuted / padded FC weights.  Pure layout work, done
# once outside the jitted forward.
# ---------------------------------------------------------------------------

CONST_ORDER = ("k1", "b1r", "rse28", "rso28", "cse168", "cso168",
               "k2", "b2r", "rse10", "rso10", "cse160", "cso160",
               "a1", "b1f", "w2f", "b2f", "w3f", "b3f")


def prepare_constants(params):
    w1 = np.asarray(params["conv1_w"], np.float32)   # [6,1,5,5]
    b1 = np.asarray(params["conv1_b"], np.float32)
    w2 = np.asarray(params["conv2_w"], np.float32)   # [16,6,5,5]
    b2 = np.asarray(params["conv2_b"], np.float32)
    fw1 = np.asarray(params["fc1_w"], np.float32)    # [120,400]
    fb1 = np.asarray(params["fc1_b"], np.float32)
    fw2 = np.asarray(params["fc2_w"], np.float32)    # [84,120]
    fb2 = np.asarray(params["fc2_b"], np.float32)
    fw3 = np.asarray(params["fc3_w"], np.float32)    # [10,84]
    fb3 = np.asarray(params["fc3_b"], np.float32)

    def conv_band(w, w_in, ow_out):
        # K[i, cin*W_in + w_in, oc*OW + ow] = w[oc, cin, i, w_in - ow]
        oc_n, cin_n, kh, kw = w.shape
        k = np.zeros((kh, cin_n * w_in, oc_n * ow_out), np.float32)
        for i in range(kh):
            for c in range(cin_n):
                for oc in range(oc_n):
                    for ow in range(ow_out):
                        for j in range(kw):
                            k[i, c * w_in + ow + j, oc * ow_out + ow] = w[oc, c, i, j]
        return k

    def row_sel(n):
        half = n // 2
        e = np.zeros((half, n), np.float32)
        o = np.zeros((half, n), np.float32)
        idx = np.arange(half)
        e[idx, 2 * idx] = 1.0
        o[idx, 2 * idx + 1] = 1.0
        return e, o

    def col_sel(cnum, w):
        half = w // 2
        e = np.zeros((cnum * w, cnum * half), np.float32)
        o = np.zeros((cnum * w, cnum * half), np.float32)
        for c in range(cnum):
            for pw in range(half):
                e[c * w + 2 * pw, c * half + pw] = 1.0
                o[c * w + 2 * pw + 1, c * half + pw] = 1.0
        return e, o

    rse28, rso28 = row_sel(28)
    cse168, cso168 = col_sel(6, 28)
    rse10, rso10 = row_sel(10)
    cse160, cso160 = col_sel(16, 10)

    # fc1 with PyTorch flatten order (c*25 + h*5 + w) folded in:
    # A[h, c*5+w, n] = fc1_w[n, c*25 + h*5 + w], output lanes padded to 128.
    a1 = np.transpose(fw1.reshape(120, 16, 5, 5), (2, 1, 3, 0)).reshape(5, 80, 120)
    a1 = np.pad(a1, ((0, 0), (0, 0), (0, 128 - 120))).astype(np.float32)

    w2f = np.zeros((128, 128), np.float32)
    w2f[:120, :84] = fw2.T
    w3f = np.zeros((128, 128), np.float32)
    w3f[:84, :10] = fw3.T

    def pad_row(v, n=128):
        out = np.zeros((1, n), np.float32)
        out[0, :v.shape[0]] = v
        return out

    consts = {
        "k1": conv_band(w1, 32, 28),                            # [5, 32, 168]
        "b1r": np.repeat(b1, 28)[None, :].astype(np.float32),   # [1, 168]
        "rse28": rse28, "rso28": rso28,                         # [14, 28]
        "cse168": cse168, "cso168": cso168,                     # [168, 84]
        "k2": conv_band(w2, 14, 10),                            # [5, 84, 160]
        "b2r": np.repeat(b2, 10)[None, :].astype(np.float32),   # [1, 160]
        "rse10": rse10, "rso10": rso10,                         # [5, 10]
        "cse160": cse160, "cso160": cso160,                     # [160, 80]
        "a1": a1,                                               # [5, 80, 128]
        "b1f": pad_row(fb1),                                    # [1, 128]
        "w2f": w2f, "b2f": pad_row(fb2),
        "w3f": w3f, "b3f": pad_row(fb3),
    }
    return {k: jnp.asarray(v) for k, v in consts.items()}


# ---------------------------------------------------------------------------
# Forward pass: one fused pallas_call, grid over batch ("parallel" => megacore
# sharding on v7x), whole-array VMEM blocks for the resident weights.
# ---------------------------------------------------------------------------

def _zero_map(n):
    return lambda b: (0,) * n


@jax.jit
def net_forward(consts, x):
    # x: [B, 1, 32, 32] float32 (NCHW like PyTorch)
    B = x.shape[0]
    const_arrays = [consts[k] for k in CONST_ORDER]

    x_spec = pl.BlockSpec((1, 1, 32, 32), lambda b: (b, 0, 0, 0))
    const_specs = [pl.BlockSpec(a.shape, _zero_map(a.ndim)) for a in const_arrays]

    out = pl.pallas_call(
        _lenet_kernel,
        out_shape=jax.ShapeDtypeStruct((B, 1, 128), jnp.float32),
        grid=(B,),
        in_specs=[x_spec] + const_specs,
        out_specs=pl.BlockSpec((1, 1, 128), lambda b: (b, 0, 0)),
        compiler_params=pltpu.CompilerParams(
            dimension_semantics=("parallel",)),
    )(x, *const_arrays)
    return out[:, 0, :10]          # drop the lane padding (logits 10..127 == 0)


# ---------------------------------------------------------------------------
# Parameter init (deterministic, PyTorch-default-like uniform) and a pure-XLA
# reference implementation for validation.
# ---------------------------------------------------------------------------

def init_params(key):
    ks = jax.random.split(key, 10)

    def uni(k, shape, fan_in):
        bound = 1.0 / jnp.sqrt(float(fan_in))
        return jax.random.uniform(k, shape, jnp.float32, -bound, bound)

    return {
        "conv1_w": uni(ks[0], (6, 1, 5, 5), 1 * 5 * 5),
        "conv1_b": uni(ks[1], (6,), 1 * 5 * 5),
        "conv2_w": uni(ks[2], (16, 6, 5, 5), 6 * 5 * 5),
        "conv2_b": uni(ks[3], (16,), 6 * 5 * 5),
        "fc1_w": uni(ks[4], (120, 400), 400),
        "fc1_b": uni(ks[5], (120,), 400),
        "fc2_w": uni(ks[6], (84, 120), 120),
        "fc2_b": uni(ks[7], (84,), 120),
        "fc3_w": uni(ks[8], (10, 84), 84),
        "fc3_b": uni(ks[9], (10,), 84),
    }


def reference_forward(params, x):
    dn = ("NCHW", "OIHW", "NCHW")
    B = x.shape[0]
    y = lax.conv_general_dilated(x, params["conv1_w"], (1, 1), "VALID",
                                 dimension_numbers=dn)
    y = jax.nn.relu(y + params["conv1_b"][None, :, None, None])
    y = y.reshape(B, 6, 14, 2, 14, 2).max(axis=(3, 5))
    y = lax.conv_general_dilated(y, params["conv2_w"], (1, 1), "VALID",
                                 dimension_numbers=dn)
    y = jax.nn.relu(y + params["conv2_b"][None, :, None, None])
    y = y.reshape(B, 16, 5, 2, 5, 2).max(axis=(3, 5))
    y = y.reshape(B, 400)
    y = jax.nn.relu(y @ params["fc1_w"].T + params["fc1_b"])
    y = jax.nn.relu(y @ params["fc2_w"].T + params["fc2_b"])
    return y @ params["fc3_w"].T + params["fc3_b"]


if __name__ == "__main__":
    key = jax.random.PRNGKey(0)
    pkey, xkey = jax.random.split(key)
    params = init_params(pkey)
    consts = prepare_constants(params)       # one-time host-side weight prep

    # LeNet expects 32x32 single-channel input so flatten gives 16*5*5.
    x = jax.random.normal(xkey, (2, 1, 32, 32), dtype=jnp.float32)

    out = jax.block_until_ready(net_forward(consts, x))
    assert out.shape == (2, 10)
    assert bool(jnp.all(jnp.isfinite(out)))

    ref = reference_forward(params, x)
    max_err = float(jnp.max(jnp.abs(out - ref)))
    assert max_err < 2e-2, f"mismatch vs XLA reference: {max_err}"

    print("KERNEL_OK")
</pallas_src>

<mosaic_0001>
module attributes {stable_mosaic.version = 11 : i64} {
  func.func @_lenet_kernel(%arg0: i32, %arg1: memref<1x1x32x32xf32, #tpu.memory_space<vmem>>, %arg2: memref<5x32x168xf32, #tpu.memory_space<vmem>>, %arg3: memref<1x168xf32, #tpu.memory_space<vmem>>, %arg4: memref<14x28xf32, #tpu.memory_space<vmem>>, %arg5: memref<14x28xf32, #tpu.memory_space<vmem>>, %arg6: memref<168x84xf32, #tpu.memory_space<vmem>>, %arg7: memref<168x84xf32, #tpu.memory_space<vmem>>, %arg8: memref<5x84x160xf32, #tpu.memory_space<vmem>>, %arg9: memref<1x160xf32, #tpu.memory_space<vmem>>, %arg10: memref<5x10xf32, #tpu.memory_space<vmem>>, %arg11: memref<5x10xf32, #tpu.memory_space<vmem>>, %arg12: memref<160x80xf32, #tpu.memory_space<vmem>>, %arg13: memref<160x80xf32, #tpu.memory_space<vmem>>, %arg14: memref<5x80x128xf32, #tpu.memory_space<vmem>>, %arg15: memref<1x128xf32, #tpu.memory_space<vmem>>, %arg16: memref<128x128xf32, #tpu.memory_space<vmem>>, %arg17: memref<1x128xf32, #tpu.memory_space<vmem>>, %arg18: memref<128x128xf32, #tpu.memory_space<vmem>>, %arg19: memref<1x128xf32, #tpu.memory_space<vmem>>, %arg20: memref<1x1x128xf32, #tpu.memory_space<vmem>>) attributes {dimension_semantics = [#tpu.dimension_semantics<parallel>], iteration_bounds = array<i64: 2>, scalar_prefetch = 0 : i64, scratch_operands = 0 : i64, tpu.core_type = #tpu.core_type<tc>, window_params = [{transform_indices = @transform_0, window_bounds = array<i64: 1, 1, 32, 32>}, {pipeline_mode = #tpu.pipeline_mode<synchronous>, transform_indices = @transform_1, window_bounds = array<i64: 5, 32, 168>}, {pipeline_mode = #tpu.pipeline_mode<synchronous>, transform_indices = @transform_2, window_bounds = array<i64: 1, 168>}, {pipeline_mode = #tpu.pipeline_mode<synchronous>, transform_indices = @transform_3, window_bounds = array<i64: 14, 28>}, {pipeline_mode = #tpu.pipeline_mode<synchronous>, transform_indices = @transform_4, window_bounds = array<i64: 14, 28>}, {pipeline_mode = #tpu.pipeline_mode<synchronous>, transform_indices = @transform_5, window_bounds = array<i64: 168, 84>}, {pipeline_mode = #tpu.pipeline_mode<synchronous>, transform_indices = @transform_6, window_bounds = array<i64: 168, 84>}, {pipeline_mode = #tpu.pipeline_mode<synchronous>, transform_indices = @transform_7, window_bounds = array<i64: 5, 84, 160>}, {pipeline_mode = #tpu.pipeline_mode<synchronous>, transform_indices = @transform_8, window_bounds = array<i64: 1, 160>}, {pipeline_mode = #tpu.pipeline_mode<synchronous>, transform_indices = @transform_9, window_bounds = array<i64: 5, 10>}, {pipeline_mode = #tpu.pipeline_mode<synchronous>, transform_indices = @transform_10, window_bounds = array<i64: 5, 10>}, {pipeline_mode = #tpu.pipeline_mode<synchronous>, transform_indices = @transform_11, window_bounds = array<i64: 160, 80>}, {pipeline_mode = #tpu.pipeline_mode<synchronous>, transform_indices = @transform_12, window_bounds = array<i64: 160, 80>}, {pipeline_mode = #tpu.pipeline_mode<synchronous>, transform_indices = @transform_13, window_bounds = array<i64: 5, 80, 128>}, {pipeline_mode = #tpu.pipeline_mode<synchronous>, transform_indices = @transform_14, window_bounds = array<i64: 1, 128>}, {pipeline_mode = #tpu.pipeline_mode<synchronous>, transform_indices = @transform_15, window_bounds = array<i64: 128, 128>}, {pipeline_mode = #tpu.pipeline_mode<synchronous>, transform_indices = @transform_16, window_bounds = array<i64: 1, 128>}, {pipeline_mode = #tpu.pipeline_mode<synchronous>, transform_indices = @transform_17, window_bounds = array<i64: 128, 128>}, {pipeline_mode = #tpu.pipeline_mode<synchronous>, transform_indices = @transform_18, window_bounds = array<i64: 1, 128>}, {transform_indices = @transform_19, window_bounds = array<i64: 1, 1, 128>}]} {
    %c0 = arith.constant 0 : index
    %c0_0 = arith.constant 0 : index
    %c0_1 = arith.constant 0 : index
    %c0_2 = arith.constant 0 : index
    %0 = vector.load %arg1[%c0, %c0_0, %c0_1, %c0_2] : memref<1x1x32x32xf32, #tpu.memory_space<vmem>>, vector<1x1x32x32xf32>
    %1 = vector.shape_cast %0 : vector<1x1x32x32xf32> to vector<32x32xf32>
    %2 = vector.extract_strided_slice %1 {offsets = [0, 0], sizes = [28, 32], strides = [1, 1]} : vector<32x32xf32> to vector<28x32xf32>
    %c0_3 = arith.constant 0 : index
    %c0_4 = arith.constant 0 : index
    %c0_5 = arith.constant 0 : index
    %3 = vector.load %arg2[%c0_3, %c0_4, %c0_5] : memref<5x32x168xf32, #tpu.memory_space<vmem>>, vector<1x32x168xf32>
    %4 = vector.shape_cast %3 : vector<1x32x168xf32> to vector<32x168xf32>
    %cst = arith.constant dense<0.000000e+00> : vector<28x168xf32>
    %5 = tpu.matmul %2, %4, %cst {dimension_numbers = #tpu.dot_dimension_numbers<[1], [0], [0], [1], [0, 0, 1, 1], [], []>} : vector<28x32xf32>, vector<32x168xf32>, vector<28x168xf32> -> vector<28x168xf32>
    %6 = vector.extract_strided_slice %1 {offsets = [1, 0], sizes = [28, 32], strides = [1, 1]} : vector<32x32xf32> to vector<28x32xf32>
    %c1 = arith.constant 1 : index
    %c0_6 = arith.constant 0 : index
    %c0_7 = arith.constant 0 : index
    %7 = vector.load %arg2[%c1, %c0_6, %c0_7] : memref<5x32x168xf32, #tpu.memory_space<vmem>>, vector<1x32x168xf32>
    %8 = vector.shape_cast %7 : vector<1x32x168xf32> to vector<32x168xf32>
    %cst_8 = arith.constant dense<0.000000e+00> : vector<28x168xf32>
    %9 = tpu.matmul %6, %8, %cst_8 {dimension_numbers = #tpu.dot_dimension_numbers<[1], [0], [0], [1], [0, 0, 1, 1], [], []>} : vector<28x32xf32>, vector<32x168xf32>, vector<28x168xf32> -> vector<28x168xf32>
    %10 = arith.addf %5, %9 : vector<28x168xf32>
    %11 = vector.extract_strided_slice %1 {offsets = [2, 0], sizes = [28, 32], strides = [1, 1]} : vector<32x32xf32> to vector<28x32xf32>
    %c2 = arith.constant 2 : index
    %c0_9 = arith.constant 0 : index
    %c0_10 = arith.constant 0 : index
    %12 = vector.load %arg2[%c2, %c0_9, %c0_10] : memref<5x32x168xf32, #tpu.memory_space<vmem>>, vector<1x32x168xf32>
    %13 = vector.shape_cast %12 : vector<1x32x168xf32> to vector<32x168xf32>
    %cst_11 = arith.constant dense<0.000000e+00> : vector<28x168xf32>
    %14 = tpu.matmul %11, %13, %cst_11 {dimension_numbers = #tpu.dot_dimension_numbers<[1], [0], [0], [1], [0, 0, 1, 1], [], []>} : vector<28x32xf32>, vector<32x168xf32>, vector<28x168xf32> -> vector<28x168xf32>
    %15 = arith.addf %10, %14 : vector<28x168xf32>
    %16 = vector.extract_strided_slice %1 {offsets = [3, 0], sizes = [28, 32], strides = [1, 1]} : vector<32x32xf32> to vector<28x32xf32>
    %c3 = arith.constant 3 : index
    %c0_12 = arith.constant 0 : index
    %c0_13 = arith.constant 0 : index
    %17 = vector.load %arg2[%c3, %c0_12, %c0_13] : memref<5x32x168xf32, #tpu.memory_space<vmem>>, vector<1x32x168xf32>
    %18 = vector.shape_cast %17 : vector<1x32x168xf32> to vector<32x168xf32>
    %cst_14 = arith.constant dense<0.000000e+00> : vector<28x168xf32>
    %19 = tpu.matmul %16, %18, %cst_14 {dimension_numbers = #tpu.dot_dimension_numbers<[1], [0], [0], [1], [0, 0, 1, 1], [], []>} : vector<28x32xf32>, vector<32x168xf32>, vector<28x168xf32> -> vector<28x168xf32>
    %20 = arith.addf %15, %19 : vector<28x168xf32>
    %21 = vector.extract_strided_slice %1 {offsets = [4, 0], sizes = [28, 32], strides = [1, 1]} : vector<32x32xf32> to vector<28x32xf32>
    %c4 = arith.constant 4 : index
    %c0_15 = arith.constant 0 : index
    %c0_16 = arith.constant 0 : index
    %22 = vector.load %arg2[%c4, %c0_15, %c0_16] : memref<5x32x168xf32, #tpu.memory_space<vmem>>, vector<1x32x168xf32>
    %23 = vector.shape_cast %22 : vector<1x32x168xf32> to vector<32x168xf32>
    %cst_17 = arith.constant dense<0.000000e+00> : vector<28x168xf32>
    %24 = tpu.matmul %21, %23, %cst_17 {dimension_numbers = #tpu.dot_dimension_numbers<[1], [0], [0], [1], [0, 0, 1, 1], [], []>} : vector<28x32xf32>, vector<32x168xf32>, vector<28x168xf32> -> vector<28x168xf32>
    %25 = arith.addf %20, %24 : vector<28x168xf32>
    %c0_18 = arith.constant 0 : index
    %c0_19 = arith.constant 0 : index
    %26 = vector.load %arg3[%c0_18, %c0_19] : memref<1x168xf32, #tpu.memory_space<vmem>>, vector<1x168xf32>
    %27 = vector.broadcast %26 : vector<1x168xf32> to vector<28x168xf32>
    %28 = arith.addf %25, %27 : vector<28x168xf32>
    %cst_20 = arith.constant 0.000000e+00 : f32
    %29 = vector.broadcast %cst_20 : f32 to vector<28x168xf32>
    %30 = arith.maximumf %28, %29 : vector<28x168xf32>
    %c0_21 = arith.constant 0 : index
    %c0_22 = arith.constant 0 : index
    %31 = vector.load %arg4[%c0_21, %c0_22] : memref<14x28xf32, #tpu.memory_space<vmem>>, vector<14x28xf32>
    %cst_23 = arith.constant dense<0.000000e+00> : vector<14x168xf32>
    %32 = tpu.matmul %31, %30, %cst_23 {dimension_numbers = #tpu.dot_dimension_numbers<[1], [0], [0], [1], [0, 0, 1, 1], [], []>} : vector<14x28xf32>, vector<28x168xf32>, vector<14x168xf32> -> vector<14x168xf32>
    %c0_24 = arith.constant 0 : index
    %c0_25 = arith.constant 0 : index
    %33 = vector.load %arg5[%c0_24, %c0_25] : memref<14x28xf32, #tpu.memory_space<vmem>>, vector<14x28xf32>
    %cst_26 = arith.constant dense<0.000000e+00> : vector<14x168xf32>
    %34 = tpu.matmul %33, %30, %cst_26 {dimension_numbers = #tpu.dot_dimension_numbers<[1], [0], [0], [1], [0, 0, 1, 1], [], []>} : vector<14x28xf32>, vector<28x168xf32>, vector<14x168xf32> -> vector<14x168xf32>
    %35 = arith.maximumf %32, %34 : vector<14x168xf32>
    %c0_27 = arith.constant 0 : index
    %c0_28 = arith.constant 0 : index
    %36 = vector.load %arg6[%c0_27, %c0_28] : memref<168x84xf32, #tpu.memory_space<vmem>>, vector<168x84xf32>
    %cst_29 = arith.constant dense<0.000000e+00> : vector<14x84xf32>
    %37 = tpu.matmul %35, %36, %cst_29 {dimension_numbers = #tpu.dot_dimension_numbers<[1], [0], [0], [1], [0, 0, 1, 1], [], []>} : vector<14x168xf32>, vector<168x84xf32>, vector<14x84xf32> -> vector<14x84xf32>
    %c0_30 = arith.constant 0 : index
    %c0_31 = arith.constant 0 : index
    %38 = vector.load %arg7[%c0_30, %c0_31] : memref<168x84xf32, #tpu.memory_space<vmem>>, vector<168x84xf32>
    %cst_32 = arith.constant dense<0.000000e+00> : vector<14x84xf32>
    %39 = tpu.matmul %35, %38, %cst_32 {dimension_numbers = #tpu.dot_dimension_numbers<[1], [0], [0], [1], [0, 0, 1, 1], [], []>} : vector<14x168xf32>, vector<168x84xf32>, vector<14x84xf32> -> vector<14x84xf32>
    %40 = arith.maximumf %37, %39 : vector<14x84xf32>
    %41 = vector.extract_strided_slice %40 {offsets = [0, 0], sizes = [10, 84], strides = [1, 1]} : vector<14x84xf32> to vector<10x84xf32>
    %c0_33 = arith.constant 0 : index
    %c0_34 = arith.constant 0 : index
    %c0_35 = arith.constant 0 : index
    %42 = vector.load %arg8[%c0_33, %c0_34, %c0_35] : memref<5x84x160xf32, #tpu.memory_space<vmem>>, vector<1x84x160xf32>
    %43 = vector.shape_cast %42 : vector<1x84x160xf32> to vector<84x160xf32>
    %cst_36 = arith.constant dense<0.000000e+00> : vector<10x160xf32>
    %44 = tpu.matmul %41, %43, %cst_36 {dimension_numbers = #tpu.dot_dimension_numbers<[1], [0], [0], [1], [0, 0, 1, 1], [], []>} : vector<10x84xf32>, vector<84x160xf32>, vector<10x160xf32> -> vector<10x160xf32>
    %45 = vector.extract_strided_slice %40 {offsets = [1, 0], sizes = [10, 84], strides = [1, 1]} : vector<14x84xf32> to vector<10x84xf32>
    %c1_37 = arith.constant 1 : index
    %c0_38 = arith.constant 0 : index
    %c0_39 = arith.constant 0 : index
    %46 = vector.load %arg8[%c1_37, %c0_38, %c0_39] : memref<5x84x160xf32, #tpu.memory_space<vmem>>, vector<1x84x160xf32>
    %47 = vector.shape_cast %46 : vector<1x84x160xf32> to vector<84x160xf32>
    %cst_40 = arith.constant dense<0.000000e+00> : vector<10x160xf32>
    %48 = tpu.matmul %45, %47, %cst_40 {dimension_numbers = #tpu.dot_dimension_numbers<[1], [0], [0], [1], [0, 0, 1, 1], [], []>} : vector<10x84xf32>, vector<84x160xf32>, vector<10x160xf32> -> vector<10x160xf32>
    %49 = arith.addf %44, %48 : vector<10x160xf32>
    %50 = vector.extract_strided_slice %40 {offsets = [2, 0], sizes = [10, 84], strides = [1, 1]} : vector<14x84xf32> to vector<10x84xf32>
    %c2_41 = arith.constant 2 : index
    %c0_42 = arith.constant 0 : index
    %c0_43 = arith.constant 0 : index
    %51 = vector.load %arg8[%c2_41, %c0_42, %c0_43] : memref<5x84x160xf32, #tpu.memory_space<vmem>>, vector<1x84x160xf32>
    %52 = vector.shape_cast %51 : vector<1x84x160xf32> to vector<84x160xf32>
    %cst_44 = arith.constant dense<0.000000e+00> : vector<10x160xf32>
    %53 = tpu.matmul %50, %52, %cst_44 {dimension_numbers = #tpu.dot_dimension_numbers<[1], [0], [0], [1], [0, 0, 1, 1], [], []>} : vector<10x84xf32>, vector<84x160xf32>, vector<10x160xf32> -> vector<10x160xf32>
    %54 = arith.addf %49, %53 : vector<10x160xf32>
    %55 = vector.extract_strided_slice %40 {offsets = [3, 0], sizes = [10, 84], strides = [1, 1]} : vector<14x84xf32> to vector<10x84xf32>
    %c3_45 = arith.constant 3 : index
    %c0_46 = arith.constant 0 : index
    %c0_47 = arith.constant 0 : index
    %56 = vector.load %arg8[%c3_45, %c0_46, %c0_47] : memref<5x84x160xf32, #tpu.memory_space<vmem>>, vector<1x84x160xf32>
    %57 = vector.shape_cast %56 : vector<1x84x160xf32> to vector<84x160xf32>
    %cst_48 = arith.constant dense<0.000000e+00> : vector<10x160xf32>
    %58 = tpu.matmul %55, %57, %cst_48 {dimension_numbers = #tpu.dot_dimension_numbers<[1], [0], [0], [1], [0, 0, 1, 1], [], []>} : vector<10x84xf32>, vector<84x160xf32>, vector<10x160xf32> -> vector<10x160xf32>
    %59 = arith.addf %54, %58 : vector<10x160xf32>
    %60 = vector.extract_strided_slice %40 {offsets = [4, 0], sizes = [10, 84], strides = [1, 1]} : vector<14x84xf32> to vector<10x84xf32>
    %c4_49 = arith.constant 4 : index
    %c0_50 = arith.constant 0 : index
    %c0_51 = arith.constant 0 : index
    %61 = vector.load %arg8[%c4_49, %c0_50, %c0_51] : memref<5x84x160xf32, #tpu.memory_space<vmem>>, vector<1x84x160xf32>
    %62 = vector.shape_cast %61 : vector<1x84x160xf32> to vector<84x160xf32>
    %cst_52 = arith.constant dense<0.000000e+00> : vector<10x160xf32>
    %63 = tpu.matmul %60, %62, %cst_52 {dimension_numbers = #tpu.dot_dimension_numbers<[1], [0], [0], [1], [0, 0, 1, 1], [], []>} : vector<10x84xf32>, vector<84x160xf32>, vector<10x160xf32> -> vector<10x160xf32>
    %64 = arith.addf %59, %63 : vector<10x160xf32>
    %c0_53 = arith.constant 0 : index
    %c0_54 = arith.constant 0 : index
    %65 = vector.load %arg9[%c0_53, %c0_54] : memref<1x160xf32, #tpu.memory_space<vmem>>, vector<1x160xf32>
    %66 = vector.broadcast %65 : vector<1x160xf32> to vector<10x160xf32>
    %67 = arith.addf %64, %66 : vector<10x160xf32>
    %cst_55 = arith.constant 0.000000e+00 : f32
    %68 = vector.broadcast %cst_55 : f32 to vector<10x160xf32>
    %69 = arith.maximumf %67, %68 : vector<10x160xf32>
    %c0_56 = arith.constant 0 : index
    %c0_57 = arith.constant 0 : index
    %70 = vector.load %arg10[%c0_56, %c0_57] : memref<5x10xf32, #tpu.memory_space<vmem>>, vector<5x10xf32>
    %cst_58 = arith.constant dense<0.000000e+00> : vector<5x160xf32>
    %71 = tpu.matmul %70, %69, %cst_58 {dimension_numbers = #tpu.dot_dimension_numbers<[1], [0], [0], [1], [0, 0, 1, 1], [], []>} : vector<5x10xf32>, vector<10x160xf32>, vector<5x160xf32> -> vector<5x160xf32>
    %c0_59 = arith.constant 0 : index
    %c0_60 = arith.constant 0 : index
    %72 = vector.load %arg11[%c0_59, %c0_60] : memref<5x10xf32, #tpu.memory_space<vmem>>, vector<5x10xf32>
    %cst_61 = arith.constant dense<0.000000e+00> : vector<5x160xf32>
    %73 = tpu.matmul %72, %69, %cst_61 {dimension_numbers = #tpu.dot_dimension_numbers<[1], [0], [0], [1], [0, 0, 1, 1], [], []>} : vector<5x10xf32>, vector<10x160xf32>, vector<5x160xf32> -> vector<5x160xf32>
    %74 = arith.maximumf %71, %73 : vector<5x160xf32>
    %c0_62 = arith.constant 0 : index
    %c0_63 = arith.constant 0 : index
    %75 = vector.load %arg12[%c0_62, %c0_63] : memref<160x80xf32, #tpu.memory_space<vmem>>, vector<160x80xf32>
    %cst_64 = arith.constant dense<0.000000e+00> : vector<5x80xf32>
    %76 = tpu.matmul %74, %75, %cst_64 {dimension_numbers = #tpu.dot_dimension_numbers<[1], [0], [0], [1], [0, 0, 1, 1], [], []>} : vector<5x160xf32>, vector<160x80xf32>, vector<5x80xf32> -> vector<5x80xf32>
    %c0_65 = arith.constant 0 : index
    %c0_66 = arith.constant 0 : index
    %77 = vector.load %arg13[%c0_65, %c0_66] : memref<160x80xf32, #tpu.memory_space<vmem>>, vector<160x80xf32>
    %cst_67 = arith.constant dense<0.000000e+00> : vector<5x80xf32>
    %78 = tpu.matmul %74, %77, %cst_67 {dimension_numbers = #tpu.dot_dimension_numbers<[1], [0], [0], [1], [0, 0, 1, 1], [], []>} : vector<5x160xf32>, vector<160x80xf32>, vector<5x80xf32> -> vector<5x80xf32>
    %79 = arith.maximumf %76, %78 : vector<5x80xf32>
    %80 = vector.extract_strided_slice %79 {offsets = [0, 0], sizes = [1, 80], strides = [1, 1]} : vector<5x80xf32> to vector<1x80xf32>
    %c0_68 = arith.constant 0 : index
    %c0_69 = arith.constant 0 : index
    %c0_70 = arith.constant 0 : index
    %81 = vector.load %arg14[%c0_68, %c0_69, %c0_70] : memref<5x80x128xf32, #tpu.memory_space<vmem>>, vector<1x80x128xf32>
    %82 = vector.shape_cast %81 : vector<1x80x128xf32> to vector<80x128xf32>
    %cst_71 = arith.constant dense<0.000000e+00> : vector<1x128xf32>
    %83 = tpu.matmul %80, %82, %cst_71 {dimension_numbers = #tpu.dot_dimension_numbers<[1], [0], [0], [1], [0, 0, 1, 1], [], []>} : vector<1x80xf32>, vector<80x128xf32>, vector<1x128xf32> -> vector<1x128xf32>
    %84 = vector.extract_strided_slice %79 {offsets = [1, 0], sizes = [1, 80], strides = [1, 1]} : vector<5x80xf32> to vector<1x80xf32>
    %c1_72 = arith.constant 1 : index
    %c0_73 = arith.constant 0 : index
    %c0_74 = arith.constant 0 : index
    %85 = vector.load %arg14[%c1_72, %c0_73, %c0_74] : memref<5x80x128xf32, #tpu.memory_space<vmem>>, vector<1x80x128xf32>
    %86 = vector.shape_cast %85 : vector<1x80x128xf32> to vector<80x128xf32>
    %cst_75 = arith.constant dense<0.000000e+00> : vector<1x128xf32>
    %87 = tpu.matmul %84, %86, %cst_75 {dimension_numbers = #tpu.dot_dimension_numbers<[1], [0], [0], [1], [0, 0, 1, 1], [], []>} : vector<1x80xf32>, vector<80x128xf32>, vector<1x128xf32> -> vector<1x128xf32>
    %88 = arith.addf %83, %87 : vector<1x128xf32>
    %89 = vector.extract_strided_slice %79 {offsets = [2, 0], sizes = [1, 80], strides = [1, 1]} : vector<5x80xf32> to vector<1x80xf32>
    %c2_76 = arith.constant 2 : index
    %c0_77 = arith.constant 0 : index
    %c0_78 = arith.constant 0 : index
    %90 = vector.load %arg14[%c2_76, %c0_77, %c0_78] : memref<5x80x128xf32, #tpu.memory_space<vmem>>, vector<1x80x128xf32>
    %91 = vector.shape_cast %90 : vector<1x80x128xf32> to vector<80x128xf32>
    %cst_79 = arith.constant dense<0.000000e+00> : vector<1x128xf32>
    %92 = tpu.matmul %89, %91, %cst_79 {dimension_numbers = #tpu.dot_dimension_numbers<[1], [0], [0], [1], [0, 0, 1, 1], [], []>} : vector<1x80xf32>, vector<80x128xf32>, vector<1x128xf32> -> vector<1x128xf32>
    %93 = arith.addf %88, %92 : vector<1x128xf32>
    %94 = vector.extract_strided_slice %79 {offsets = [3, 0], sizes = [1, 80], strides = [1, 1]} : vector<5x80xf32> to vector<1x80xf32>
    %c3_80 = arith.constant 3 : index
    %c0_81 = arith.constant 0 : index
    %c0_82 = arith.constant 0 : index
    %95 = vector.load %arg14[%c3_80, %c0_81, %c0_82] : memref<5x80x128xf32, #tpu.memory_space<vmem>>, vector<1x80x128xf32>
    %96 = vector.shape_cast %95 : vector<1x80x128xf32> to vector<80x128xf32>
    %cst_83 = arith.constant dense<0.000000e+00> : vector<1x128xf32>
    %97 = tpu.matmul %94, %96, %cst_83 {dimension_numbers = #tpu.dot_dimension_numbers<[1], [0], [0], [1], [0, 0, 1, 1], [], []>} : vector<1x80xf32>, vector<80x128xf32>, vector<1x128xf32> -> vector<1x128xf32>
    %98 = arith.addf %93, %97 : vector<1x128xf32>
    %99 = vector.extract_strided_slice %79 {offsets = [4, 0], sizes = [1, 80], strides = [1, 1]} : vector<5x80xf32> to vector<1x80xf32>
    %c4_84 = arith.constant 4 : index
    %c0_85 = arith.constant 0 : index
    %c0_86 = arith.constant 0 : index
    %100 = vector.load %arg14[%c4_84, %c0_85, %c0_86] : memref<5x80x128xf32, #tpu.memory_space<vmem>>, vector<1x80x128xf32>
    %101 = vector.shape_cast %100 : vector<1x80x128xf32> to vector<80x128xf32>
    %cst_87 = arith.constant dense<0.000000e+00> : vector<1x128xf32>
    %102 = tpu.matmul %99, %101, %cst_87 {dimension_numbers = #tpu.dot_dimension_numbers<[1], [0], [0], [1], [0, 0, 1, 1], [], []>} : vector<1x80xf32>, vector<80x128xf32>, vector<1x128xf32> -> vector<1x128xf32>
    %103 = arith.addf %98, %102 : vector<1x128xf32>
    %c0_88 = arith.constant 0 : index
    %c0_89 = arith.constant 0 : index
    %104 = vector.load %arg15[%c0_88, %c0_89] : memref<1x128xf32, #tpu.memory_space<vmem>>, vector<1x128xf32>
    %105 = arith.addf %103, %104 : vector<1x128xf32>
    %cst_90 = arith.constant 0.000000e+00 : f32
    %106 = vector.broadcast %cst_90 : f32 to vector<1x128xf32>
    %107 = arith.maximumf %105, %106 : vector<1x128xf32>
    %c0_91 = arith.constant 0 : index
    %c0_92 = arith.constant 0 : index
    %108 = vector.load %arg16[%c0_91, %c0_92] : memref<128x128xf32, #tpu.memory_space<vmem>>, vector<128x128xf32>
    %cst_93 = arith.constant dense<0.000000e+00> : vector<1x128xf32>
    %109 = tpu.matmul %107, %108, %cst_93 {dimension_numbers = #tpu.dot_dimension_numbers<[1], [0], [0], [1], [0, 0, 1, 1], [], []>} : vector<1x128xf32>, vector<128x128xf32>, vector<1x128xf32> -> vector<1x128xf32>
    %c0_94 = arith.constant 0 : index
    %c0_95 = arith.constant 0 : index
    %110 = vector.load %arg17[%c0_94, %c0_95] : memref<1x128xf32, #tpu.memory_space<vmem>>, vector<1x128xf32>
    %111 = arith.addf %109, %110 : vector<1x128xf32>
    %cst_96 = arith.constant 0.000000e+00 : f32
    %112 = vector.broadcast %cst_96 : f32 to vector<1x128xf32>
    %113 = arith.maximumf %111, %112 : vector<1x128xf32>
    %c0_97 = arith.constant 0 : index
    %c0_98 = arith.constant 0 : index
    %114 = vector.load %arg18[%c0_97, %c0_98] : memref<128x128xf32, #tpu.memory_space<vmem>>, vector<128x128xf32>
    %cst_99 = arith.constant dense<0.000000e+00> : vector<1x128xf32>
    %115 = tpu.matmul %113, %114, %cst_99 {dimension_numbers = #tpu.dot_dimension_numbers<[1], [0], [0], [1], [0, 0, 1, 1], [], []>} : vector<1x128xf32>, vector<128x128xf32>, vector<1x128xf32> -> vector<1x128xf32>
    %c0_100 = arith.constant 0 : index
    %c0_101 = arith.constant 0 : index
    %116 = vector.load %arg19[%c0_100, %c0_101] : memref<1x128xf32, #tpu.memory_space<vmem>>, vector<1x128xf32>
    %117 = arith.addf %115, %116 : vector<1x128xf32>
    %c0_102 = arith.constant 0 : index
    %c0_103 = arith.constant 0 : index
    %c0_104 = arith.constant 0 : index
    %118 = vector.load %arg20[%c0_102, %c0_103, %c0_104] : memref<1x1x128xf32, #tpu.memory_space<vmem>>, vector<1x1x128xf32>
    %119 = vector.shape_cast %118 : vector<1x1x128xf32> to vector<1x128xf32>
    %120 = vector.shape_cast %117 : vector<1x128xf32> to vector<1x1x128xf32>
    tpu.vector_store %arg20[%c0_102, %c0_103, %c0_104], %120 {strides = array<i32>} : memref<1x1x128xf32, #tpu.memory_space<vmem>>, vector<1x1x128xf32>,
    return
  }
  func.func @transform_0(%arg0: i32) -> (i32, i32, i32, i32) {
    %c0_i32 = arith.constant 0 : i32
    %c0_i32_0 = arith.constant 0 : i32
    %c0_i32_1 = arith.constant 0 : i32
    %c0_i32_2 = arith.constant 0 : i32
    return %arg0, %c0_i32, %c0_i32_0, %c0_i32_1 : i32, i32, i32, i32
  }
  func.func @transform_1(%arg0: i32) -> (i32, i32, i32) {
    %c0_i32 = arith.constant 0 : i32
    %c0_i32_0 = arith.constant 0 : i32
    %c0_i32_1 = arith.constant 0 : i32
    %c0_i32_2 = arith.constant 0 : i32
    return %c0_i32, %c0_i32_0, %c0_i32_1 : i32, i32, i32
  }
  func.func @transform_2(%arg0: i32) -> (i32, i32) {
    %c0_i32 = arith.constant 0 : i32
    %c0_i32_0 = arith.constant 0 : i32
    %c0_i32_1 = arith.constant 0 : i32
    return %c0_i32, %c0_i32_0 : i32, i32
  }
  func.func @transform_3(%arg0: i32) -> (i32, i32) {
    %c0_i32 = arith.constant 0 : i32
    %c0_i32_0 = arith.constant 0 : i32
    %c0_i32_1 = arith.constant 0 : i32
    return %c0_i32, %c0_i32_0 : i32, i32
  }
  func.func @transform_4(%arg0: i32) -> (i32, i32) {
    %c0_i32 = arith.constant 0 : i32
    %c0_i32_0 = arith.constant 0 : i32
    %c0_i32_1 = arith.constant 0 : i32
    return %c0_i32, %c0_i32_0 : i32, i32
  }
  func.func @transform_5(%arg0: i32) -> (i32, i32) {
    %c0_i32 = arith.constant 0 : i32
    %c0_i32_0 = arith.constant 0 : i32
    %c0_i32_1 = arith.constant 0 : i32
    return %c0_i32, %c0_i32_0 : i32, i32
  }
  func.func @transform_6(%arg0: i32) -> (i32, i32) {
    %c0_i32 = arith.constant 0 : i32
    %c0_i32_0 = arith.constant 0 : i32
    %c0_i32_1 = arith.constant 0 : i32
    return %c0_i32, %c0_i32_0 : i32, i32
  }
  func.func @transform_7(%arg0: i32) -> (i32, i32, i32) {
    %c0_i32 = arith.constant 0 : i32
    %c0_i32_0 = arith.constant 0 : i32
    %c0_i32_1 = arith.constant 0 : i32
    %c0_i32_2 = arith.constant 0 : i32
    return %c0_i32, %c0_i32_0, %c0_i32_1 : i32, i32, i32
  }
  func.func @transform_8(%arg0: i32) -> (i32, i32) {
    %c0_i32 = arith.constant 0 : i32
    %c0_i32_0 = arith.constant 0 : i32
    %c0_i32_1 = arith.constant 0 : i32
    return %c0_i32, %c0_i32_0 : i32, i32
  }
  func.func @transform_9(%arg0: i32) -> (i32, i32) {
    %c0_i32 = arith.constant 0 : i32
    %c0_i32_0 = arith.constant 0 : i32
    %c0_i32_1 = arith.constant 0 : i32
    return %c0_i32, %c0_i32_0 : i32, i32
  }
  func.func @transform_10(%arg0: i32) -> (i32, i32) {
    %c0_i32 = arith.constant 0 : i32
    %c0_i32_0 = arith.constant 0 : i32
    %c0_i32_1 = arith.constant 0 : i32
    return %c0_i32, %c0_i32_0 : i32, i32
  }
  func.func @transform_11(%arg0: i32) -> (i32, i32) {
    %c0_i32 = arith.constant 0 : i32
    %c0_i32_0 = arith.constant 0 : i32
    %c0_i32_1 = arith.constant 0 : i32
    return %c0_i32, %c0_i32_0 : i32, i32
  }
  func.func @transform_12(%arg0: i32) -> (i32, i32) {
    %c0_i32 = arith.constant 0 : i32
    %c0_i32_0 = arith.constant 0 : i32
    %c0_i32_1 = arith.constant 0 : i32
    return %c0_i32, %c0_i32_0 : i32, i32
  }
  func.func @transform_13(%arg0: i32) -> (i32, i32, i32) {
    %c0_i32 = arith.constant 0 : i32
    %c0_i32_0 = arith.constant 0 : i32
    %c0_i32_1 = arith.constant 0 : i32
    %c0_i32_2 = arith.constant 0 : i32
    return %c0_i32, %c0_i32_0, %c0_i32_1 : i32, i32, i32
  }
  func.func @transform_14(%arg0: i32) -> (i32, i32) {
    %c0_i32 = arith.constant 0 : i32
    %c0_i32_0 = arith.constant 0 : i32
    %c0_i32_1 = arith.constant 0 : i32
    return %c0_i32, %c0_i32_0 : i32, i32
  }
  func.func @transform_15(%arg0: i32) -> (i32, i32) {
    %c0_i32 = arith.constant 0 : i32
    %c0_i32_0 = arith.constant 0 : i32
    %c0_i32_1 = arith.constant 0 : i32
    return %c0_i32, %c0_i32_0 : i32, i32
  }
  func.func @transform_16(%arg0: i32) -> (i32, i32) {
    %c0_i32 = arith.constant 0 : i32
    %c0_i32_0 = arith.constant 0 : i32
    %c0_i32_1 = arith.constant 0 : i32
    return %c0_i32, %c0_i32_0 : i32, i32
  }
  func.func @transform_17(%arg0: i32) -> (i32, i32) {
    %c0_i32 = arith.constant 0 : i32
    %c0_i32_0 = arith.constant 0 : i32
    %c0_i32_1 = arith.constant 0 : i32
    return %c0_i32, %c0_i32_0 : i32, i32
  }
  func.func @transform_18(%arg0: i32) -> (i32, i32) {
    %c0_i32 = arith.constant 0 : i32
    %c0_i32_0 = arith.constant 0 : i32
    %c0_i32_1 = arith.constant 0 : i32
    return %c0_i32, %c0_i32_0 : i32, i32
  }
  func.func @transform_19(%arg0: i32) -> (i32, i32, i32) {
    %c0_i32 = arith.constant 0 : i32
    %c0_i32_0 = arith.constant 0 : i32
    %c0_i32_1 = arith.constant 0 : i32
    return %arg0, %c0_i32, %c0_i32_0 : i32, i32, i32
  }
}

</mosaic_0001>

<bundles_post_ra>
// kernel: net_forward.1
= control target key start
LH: loop header
LB: loop body
LE: loop exit
PB: predicated region body
PF: predicated region fallthrough
CT: control target
= control target key end

     0   :  { %s6313_s0 = inlined_call_operand.vmem [shape: f32[2,1,32,32], index: 0, kind: input, shape index: {}]   ;;  %s6314_s1 = inlined_call_operand.vmem [shape: f32[5,32,168], index: 1, kind: input, shape index: {}]   ;;  %s6315_s2 = inlined_call_operand.vmem [shape: f32[1,168], index: 2, kind: input, shape index: {}]   ;;  %s6316_s3 = inlined_call_operand.vmem [shape: f32[14,28], index: 3, kind: input, shape index: {}]   ;;  %s6317_s4 = inlined_call_operand.vmem [shape: f32[14,28], index: 4, kind: input, shape index: {}]   ;;  %s6318_s5 = inlined_call_operand.vmem [shape: f32[168,84], index: 5, kind: input, shape index: {}]   ;;  %s6319_s6 = inlined_call_operand.vmem [shape: f32[168,84], index: 6, kind: input, shape index: {}]   ;;  %s6320_s7 = inlined_call_operand.vmem [shape: f32[5,84,160], index: 7, kind: input, shape index: {}]   ;;  %s6321_s8 = inlined_call_operand.hbm [shape: f32[1,160], index: 8, kind: input, shape index: {}]   ;;  %s6322_s9 = inlined_call_operand.hbm [shape: f32[5,10], index: 9, kind: input, shape index: {}]   ;;  %s6323_s10 = inlined_call_operand.hbm [shape: f32[5,10], index: 10, kind: input, shape index: {}]   ;;  %s6324_s11 = inlined_call_operand.vmem [shape: f32[160,80], index: 11, kind: input, shape index: {}]   ;;  %s6325_s12 = inlined_call_operand.vmem [shape: f32[160,80], index: 12, kind: input, shape index: {}]   ;;  %s6326_s13 = inlined_call_operand.vmem [shape: f32[5,80,128], index: 13, kind: input, shape index: {}]   ;;  %s6327_s14 = inlined_call_operand.hbm [shape: f32[1,128], index: 14, kind: input, shape index: {}]   ;;  %s6328_s15 = inlined_call_operand.vmem [shape: f32[128,128], index: 15, kind: input, shape index: {}]   ;;  %s6329_s16 = inlined_call_operand.hbm [shape: f32[1,128], index: 16, kind: input, shape index: {}]   ;;  %s6330_s17 = inlined_call_operand.vmem [shape: f32[128,128], index: 17, kind: input, shape index: {}]   ;;  %s6331_s18 = inlined_call_operand.hbm [shape: f32[1,128], index: 18, kind: input, shape index: {}]   ;;  %s6332_s19 = inlined_call_operand.hbm [shape: f32[2,1,128], index: 19, kind: output, shape index: {}]  }
   0x1   :  { %6348 = sst [smem:[#allocation27_spill]] %s6313_s0 }
   0x2   :  { %6349 = sst [smem:[#allocation28_spill]] %s6314_s1 }
   0x3   :  { %6350 = sst [smem:[#allocation29_spill]] %s6315_s2 }
   0x4   :  { %6351 = sst [smem:[#allocation30_spill]] %s6316_s3 }
   0x5   :  { %6352 = sst [smem:[#allocation31_spill]] %s6322_s9 }
   0x6   :  { %6353 = sst [smem:[#allocation32_spill]] %s6332_s19 }
   0x7   :  { %24 = vsyncpa [#allocation3], 0 }
   0x8   :  { %25 = vsyncpa [#allocation6], 0 }
   0x9   :  { %26 = vsyncpa [#allocation9], 0 }
   0xa   :  { %27 = vsyncpa [#allocation12], 0 }
   0xb   :  { %28 = vsyncpa [#allocation4], 0 }
   0xc   :  { %30 = vsyncpa [#allocation4 + $0x1], 0  ;;  %s4801_s0 = smov 0   ;;  %s4803_s30 = smov 0  }
   0xd   :  { %s4805_s20 = smov 0   ;;  %s4807_s21 = smov 0  }
   0xe LB: > { %6354 = sst [smem:[#allocation19_spill]] %s4676_s0  ;;  %s4822_s1 = sadd.s32 4294967295, %s4688_s21   ;;  %s4688_s21 = sphi %s4807_s21, %s6389_s21   ;;  %s4684_s20 = sphi %s4805_s20, %s6392_s20   ;;  %s4680_s30 = sphi %s4803_s30, %s6391_s30   ;;  %s4676_s0 = sphi %s4801_s0, %s6390_s0  }
   0xf   : > { %6355 = sst [smem:[#allocation20_spill]] %s4680_s30  ;;  %s3350_s22 = sadd.s32 4294967294, %s4688_s21  }
  0x10   : > { %6356 = sst [smem:[#allocation21_spill]] %s4684_s20  ;;  %s4826_s2 = sadd.s32 1, %s4688_s21  }
  0x11   : > { %6357 = sst [smem:[#allocation22_spill]] %s4688_s21  ;;  %s447_s23 = sadd.s32 1, %s4684_s20 }
  0x12   : > { %6358 = sst [smem:[#allocation23_spill]] %s4826_s2  ;;  %s444_s24 = ssub.s32 %s4688_s21, %s4826_s2 }
  0x13   : > { %p457_p0 = scmp.ne.s32.totalorder %s4684_s20, %s4680_s30  ;;  %p445_p1 = scmp.eq.s32.totalorder %s444_s24, 0 }
  0x14   : > { %p458_p2 = scmp.eq.s32.totalorder %s4822_s1, 1  ;;  %p463_p3 = scmp.ne.s32.totalorder %s4680_s30, %s4676_s0 }
  0x15   : > { %p464_p4 = scmp.eq.s32.totalorder %s3350_s22, 1  ;;  %p3351_p7 = scmp.ge.s32.totalorder %s4688_s21, 1 }
  0x16   : > { %s4837_s25 = scalar_select %p445_p1, %s4684_s20, %s447_s23  }
  0x17   : > { %p4839_p5 = por %p458_p2, %p457_p0  ;;  %p4843_p6 = por %p464_p4, %p463_p3 }
  0x18   : > { %6359 = sst [smem:[#allocation24_spill]] %s4837_s25  ;;  %p471_p8 = scmp.lt.s32.totalorder %s4688_s21, 3 }
  0x19   : > { %s6360_s3 = scalar_select %p4839_p5, 1, 0 }
  0x1a   : > { %s6362_s26 = scalar_select %p4843_p6, 1, 0 }
  0x1b   : > { %6361 = sst [smem:[#allocation25_spill]] %s6360_s3  ;;  %p6342_p9 = scmp.eq.s32.totalorder %s4822_s1, 0 }
  0x1c   : > { %6363 = sst [smem:[#allocation26_spill]] %s6362_s26  ;;  %p4850_p10 = pnand %p3351_p7, %p471_p8 }
  0x1d   : > { %s4690_s28 = smov [#allocation5]   ;;  %s4691_s22 = smov [#allocation8]  }
  0x1e   : > { %s6364_s27 = scalar_select %p4850_p10, 1, 0 }
  0x1f   : > { %s516_s29 = sshll.u32 %s4690_s28, 4  ;;  %p4364_p11 = pneg %p4850_p10  ;;  %s517_s29 = int_to_ptr.vmem [resolvable:$true] %s516_s29 }
  0x20   : > { %s547_s23 = sshll.u32 %s4691_s22, 4  ;;  %s4692_s25 = smov [#allocation2]   ;;  %s4862_s23 = int_to_ptr.vmem [resolvable:$true] %s547_s23 }
  0x21   : > { %p4858_p12 = pnand %p6342_p9, %p4364_p11  ;;  %s505_s20 = sshll.u32 %s4692_s25, 4  ;;  %s4864_s20 = int_to_ptr.vmem [resolvable:$true] %s505_s20 }
  0x22   : > { %s6366_s9 = sld [smem:[#allocation31_spill]] }
  0x23   : > { %p4874_p0 = pneg %p4858_p12 }
  0x28   : > { %s4442_s28 = scalar_lea.hbm %s6366_s9, 128 }
  0x29   : > { %p4443_p13 = scmp.ne.s32.totalorder %s6366_s9, %s4442_s28  ;;  %p4449_p3 = scmp.lt.u32.totalorder %s4442_s28, %s6366_s9 }
  0x2b   : > { %p4445_p1 = pnand %p4874_p0, %p4443_p13 }
  0x2d   : > { %p4446_p2 = pneg %p4445_p1 }
  0x2f   : > { %p4451_p4 = pnand %p4449_p3, %p4446_p2 }
  0x31   : > { %4454 = shalt.err (!%p4451_p4)
}
  0x32   : > { %s4455_s2 = scalar_lea.vmem %s517_s29, 128  ;;  %p4463_p9 = scmp.lt.s32.totalorder %s517_s29, %s517_s29 }
  0x33   : > { %p4456_p7 = scmp.ne.s32.totalorder %s517_s29, %s4455_s2  ;;  %p4464_p6 = scmp.lt.s32.totalorder %s4455_s2, %s4455_s2 }
  0x35   : > { %p4458_p8 = pnand %p4456_p7, %p4874_p0  ;;  %p4465_p5 = por %p4464_p6, %p4463_p9 }
  0x37   : > { %p4459_p11 = pneg %p4458_p8 }
  0x39   : > { %p4466_p10 = pnand %p4465_p5, %p4459_p11 }
  0x3b   : > { %4469 = shalt.err (!%p4466_p10)
}
  0x3c   : > { %4370 = dma.hbm_to_vmem [thread:$0]  (!%p4858_p12), %s6366_s9, 128, %s517_s29, [#allocation6]  }
  0x3d   : > { %s4470_s28 = scalar_lea.hbm %s6327_s14, 16 }
  0x3e   : > { %p4471_p13 = scmp.ne.s32.totalorder %s6327_s14, %s4470_s28  ;;  %p4477_p5 = scmp.lt.u32.totalorder %s4470_s28, %s6327_s14 }
  0x40   : > { %p4473_p1 = pnand %p4471_p13, %p4874_p0 }
  0x42   : > { %p4474_p6 = pneg %p4473_p1 }
  0x44   : > { %p4479_p9 = pnand %p4477_p5, %p4474_p6 }
  0x46   : > { %4482 = shalt.err (!%p4479_p9)
}
  0x47   : > { %s4483_s29 = scalar_lea.vmem %s4862_s23, 16  ;;  %s4490_s3 = scalar_lea.vmem %s4862_s23, 32 }
  0x48   : > { %p4484_p10 = scmp.ne.s32.totalorder %s4862_s23, %s4483_s29  ;;  %p4491_p4 = scmp.lt.s32.totalorder %s4862_s23, %s4862_s23 }
  0x49   : > { %p4492_p7 = scmp.lt.s32.totalorder %s4490_s3, %s4483_s29 }
  0x4a   : > { %p4486_p2 = pnand %p4484_p10, %p4874_p0 }
  0x4b   : > { %p4493_p8 = por %p4492_p7, %p4491_p4 }
  0x4c   : > { %p4487_p3 = pneg %p4486_p2 }
  0x4e   : > { %p4494_p11 = pnand %p4493_p8, %p4487_p3 }
  0x50   : > { %4497 = shalt.err (!%p4494_p11)
}
  0x51   : > { %4376 = dma.hbm_to_vmem [thread:$0]  (!%p4858_p12), %s6327_s14, 16, %s4862_s23, [#allocation9]  }
  0x52   : > { %s4498_s26 = scalar_lea.hbm %s6321_s8, 32 }
  0x53   : > { %p4499_p13 = scmp.ne.s32.totalorder %s6321_s8, %s4498_s26  ;;  %p4505_p5 = scmp.lt.u32.totalorder %s4498_s26, %s6321_s8 }
  0x55   : > { %p4501_p1 = pnand %p4499_p13, %p4874_p0 }
  0x57   : > { %p4502_p6 = pneg %p4501_p1 }
  0x59   : > { %p4507_p9 = pnand %p4505_p5, %p4502_p6 }
  0x5b   : > { %4510 = shalt.err (!%p4507_p9)
}
  0x5c   : > { %s4511_s23 = scalar_lea.vmem %s4864_s20, 32  ;;  %p4519_p4 = scmp.lt.s32.totalorder %s4864_s20, %s4864_s20 }
  0x5d   : > { %p4512_p10 = scmp.ne.s32.totalorder %s4864_s20, %s4511_s23  ;;  %p4520_p7 = scmp.lt.s32.totalorder %s4511_s23, %s4511_s23 }
  0x5f   : > { %p4514_p2 = pnand %p4512_p10, %p4874_p0  ;;  %p4521_p8 = por %p4520_p7, %p4519_p4 }
  0x61   : > { %p4515_p3 = pneg %p4514_p2 }
  0x63   : > { %p4522_p11 = pnand %p4521_p8, %p4515_p3 }
  0x65   : > { %4525 = shalt.err (!%p4522_p11)
}
  0x66   : > { %4367 = dma.hbm_to_vmem [thread:$0]  (!%p4858_p12), %s6321_s8, 32, %s4864_s20, [#allocation3]  }
  0x67   : > { %s4693_s0 = smov [#allocation7]   ;;  %s4694_s19 = smov [#allocation10]  }
  0x68   : > { %s527_s21 = sshll.u32 %s4693_s0, 4  ;;  %s561_s26 = sshll.u32 %s4694_s19, 4  ;;  %s528_s21 = int_to_ptr.vmem [resolvable:$true] %s527_s21  ;;  %s562_s26 = int_to_ptr.vmem [resolvable:$true] %s561_s26 }
  0x69   : > { %s4526_s2 = scalar_lea.hbm %s6323_s10, 128 }
  0x6a   : > { %p4527_p13 = scmp.ne.s32.totalorder %s6323_s10, %s4526_s2  ;;  %p4533_p5 = scmp.lt.u32.totalorder %s4526_s2, %s6323_s10 }
  0x6c   : > { %p4529_p1 = pnand %p4527_p13, %p4874_p0 }
  0x6e   : > { %p4530_p6 = pneg %p4529_p1 }
  0x70   : > { %p4535_p9 = pnand %p4533_p5, %p4530_p6 }
  0x72   : > { %4538 = shalt.err (!%p4535_p9)
}
  0x73   : > { %s4539_s20 = scalar_lea.vmem %s528_s21, 128  ;;  %p4547_p4 = scmp.lt.s32.totalorder %s528_s21, %s528_s21 }
  0x74   : > { %p4540_p10 = scmp.ne.s32.totalorder %s528_s21, %s4539_s20  ;;  %p4548_p7 = scmp.lt.s32.totalorder %s4539_s20, %s4539_s20 }
  0x76   : > { %p4542_p2 = pnand %p4540_p10, %p4874_p0  ;;  %p4549_p8 = por %p4548_p7, %p4547_p4 }
  0x78   : > { %p4543_p3 = pneg %p4542_p2 }
  0x7a   : > { %p4550_p11 = pnand %p4549_p8, %p4543_p3 }
  0x7c   : > { %4553 = shalt.err (!%p4550_p11)
}
  0x7d   : > { %4373 = dma.hbm_to_vmem [thread:$0]  (!%p4858_p12), %s6323_s10, 128, %s528_s21, [#allocation6]  }
  0x7e   : > { %s4554_s28 = scalar_lea.hbm %s6329_s16, 16 }
  0x7f   : > { %p4555_p13 = scmp.ne.s32.totalorder %s6329_s16, %s4554_s28  ;;  %p4561_p5 = scmp.lt.u32.totalorder %s4554_s28, %s6329_s16 }
  0x81   : > { %p4557_p1 = pnand %p4555_p13, %p4874_p0 }
  0x83   : > { %p4558_p6 = pneg %p4557_p1 }
  0x85   : > { %p4563_p9 = pnand %p4561_p5, %p4558_p6 }
  0x87   : > { %4566 = shalt.err (!%p4563_p9)
}
  0x88   : > { %s4567_s3 = scalar_lea.vmem %s562_s26, 16  ;;  %s4574_s21 = scalar_lea.vmem %s562_s26, 32 }
  0x89   : > { %p4568_p10 = scmp.ne.s32.totalorder %s562_s26, %s4567_s3  ;;  %p4575_p4 = scmp.lt.s32.totalorder %s562_s26, %s562_s26 }
  0x8a   : > { %p4576_p7 = scmp.lt.s32.totalorder %s4574_s21, %s4567_s3 }
  0x8b   : > { %p4570_p2 = pnand %p4568_p10, %p4874_p0 }
  0x8c   : > { %p4577_p8 = por %p4576_p7, %p4575_p4 }
  0x8d   : > { %p4571_p3 = pneg %p4570_p2 }
  0x8f   : > { %p4578_p11 = pnand %p4577_p8, %p4571_p3 }
  0x91   : > { %4581 = shalt.err (!%p4578_p11)
}
  0x92   : > { %4379 = dma.hbm_to_vmem [thread:$0]  (!%p4858_p12), %s6329_s16, 16, %s562_s26, [#allocation9]  }
  0x93   : > { %s4695_s0 = smov [#allocation11]   ;;  %s4582_s25 = scalar_lea.hbm %s6331_s18, 16 }
  0x94   : > { %s575_s9 = sshll.u32 %s4695_s0, 4  ;;  %p4583_p13 = scmp.ne.s32.totalorder %s6331_s18, %s4582_s25  ;;  %s576_s9 = int_to_ptr.vmem [resolvable:$true] %s575_s9 }
  0x95   : > { %p4589_p5 = scmp.lt.u32.totalorder %s4582_s25, %s6331_s18 }
  0x96   : > { %p4585_p1 = pnand %p4583_p13, %p4874_p0 }
  0x98   : > { %p4586_p6 = pneg %p4585_p1 }
  0x9a   : > { %p4591_p9 = pnand %p4589_p5, %p4586_p6 }
  0x9c   : > { %4594 = shalt.err (!%p4591_p9)
}
  0x9d   : > { %s4595_s26 = scalar_lea.vmem %s576_s9, 16  ;;  %s4602_s21 = scalar_lea.vmem %s576_s9, 32 }
  0x9e   : > { %p4596_p10 = scmp.ne.s32.totalorder %s576_s9, %s4595_s26  ;;  %p4603_p4 = scmp.lt.s32.totalorder %s576_s9, %s576_s9 }
  0x9f   : > { %p4604_p7 = scmp.lt.s32.totalorder %s4602_s21, %s4595_s26 }
  0xa0   : > { %p4598_p2 = pnand %p4596_p10, %p4874_p0 }
  0xa1   : > { %p4605_p8 = por %p4604_p7, %p4603_p4 }
  0xa2   : > { %p4599_p3 = pneg %p4598_p2 }
  0xa4   : > { %p4606_p11 = pnand %p4605_p8, %p4599_p3 }
  0xa6   : > { %4609 = shalt.err (!%p4606_p11)
}
  0xa7   : > { %4382 = dma.hbm_to_vmem [thread:$0]  (!%p4858_p12), %s6331_s18, 16, %s576_s9, [#allocation12]  }
  0xa8   : > { %p6368_p13 = scmp.ne.s32.totalorder %s6364_s27, 0 }
  0xa9   : > { %p6369_p1 = scmp.eq.s32.totalorder (!%p6368_p13), %s4822_s1, 0 }
  0xaa   : > { %596 = sbr.rel (%p6368_p13) target bundleno = 2479 (0x9af), region = 96 }
  0xb1   : > { %4655 = dma.done.wait (%p6369_p1), [#allocation3], 32   ;;  %p6370_p0 = pmov %p6369_p1 }
  0xb3   : > { %4657 = vsyncadd (%p6370_p0), [#allocation3], 4294967264  ;;  %p6371_p6 = pmov %p6370_p0 }
  0xb4   : > { %p6372_p5 = pmov %p6370_p0 }
  0xb5   : > { %4659 = dma.done.wait (%p6371_p6), [#allocation6], 256  }
  0xb6   : > { %4661 = vsyncadd (%p6372_p5), [#allocation6], 4294967040  ;;  %p6373_p9 = pmov %p6370_p0 }
  0xb7   : > { %p6374_p12 = pmov %p6370_p0 }
  0xb8   : > { %4663 = dma.done.wait (%p6373_p9), [#allocation9], 32  }
  0xb9   : > { %4665 = vsyncadd (%p6374_p12), [#allocation9], 4294967264  ;;  %p6375_p10 = pmov %p6370_p0 }
  0xba   : > { %p6376_p2 = pmov %p6370_p0 }
  0xbb   : > { %4667 = dma.done.wait (%p6375_p10), [#allocation12], 16  }
  0xbc   : > { %4669 = vsyncadd (%p6376_p2), [#allocation12], 4294967280  ;;  %p671_p3 = scmp.lt.s32.totalorder %s4822_s1, 1  ;;  %v4696_v0 = vmov 0.0   ;;  %s6377_s9 = sld [smem:[#allocation27_spill]]  ;;  %vm701_vm0 = vcmask 1046528  }
  0xbd   : > { %782 = vmatprep.mubr.f32.mxu0 %v4696_v0  ;;  %794 = vmatprep.mubr.f32.mxu1 %v4696_v0  ;;  %s6378_s2 = sld [smem:[#allocation28_spill]]  ;;  %vm709_vm1 = vcmask 261120   ;;  %vm913_vm2 = vcmask 1045504   ;;  %vm1035_vm3 = vcmask 1044480   ;;  %vm1157_vm4 = vcmask 1043456   ;;  %s6381_s29 = sld [smem:[#allocation20_spill]] }
  0xbe   : > { %s672_s27 = scalar_select %p671_p3, %s4822_s1, 1  ;;  %vm4697_vm5 = vmmov 1   ;;  %vm1300_vm7 = vcmask 228352   ;;  %vm1500_vm8 = vcmask 326656   ;;  %vm1730_vm9 = vcmask 687104  }
  0xbf   : > { %vm3916_vm6 = vmpackc.low %vm1157_vm4, %vm4697_vm5  ;;  %vm2281_vm10 = vcmask 1041408   ;;  %vm2277_vm12 = vcmask 80896   ;;  %vm4699_vm13 = vmmov 0   ;;  %vm2643_vm14 = vcmask 654336   ;;  %s6382_s20 = sld [smem:[#allocation25_spill]]  ;;  %s6383_s28 = sld [smem:[#allocation32_spill]] }
  0xc0   : > { %s3596_s24 = sshll.u32 %s672_s27, 5  ;;  %s6379_s27 = sld [smem:[#allocation29_spill]]  ;;  %vm4092_vm11 = vmpackc.low %vm2281_vm10, %vm4697_vm5 }
  0xc2   : > { %s5016_s19 = scalar_lea.vmem %s6377_s9, %s3596_s24 }
  0xc3   : > { %v3369_v1 = vld [vmem:[%s6378_s2 + $0x48] sm:$0xff]  ;;  %v3371_v2 = vld [vmem:[%s6378_s2 + $0x58] sm:$0xff]  ;;  %v3368_v3 = vld [vmem:[%s6378_s2 + $0x40] sm:$0xff]  ;;  %s669_s30 = sand.u32 1, %s6381_s29  }
  0xc4   : > { %v3871_v4 = vpack.c.bf16 %v3371_v2, %v3369_v1  ;;  %v3370_v5 = vld [vmem:[%s6378_s2 + $0x50] sm:$0xff]  ;;  %v3373_v6 = vld [vmem:[%s6378_s2 + $0x68] sm:$0xff]  ;;  %v3375_v7 = vld [vmem:[%s6378_s2 + $0x78] sm:$0xff]  ;;  %s670_s24 = scalar_lea.vmem [#allocation13], %s669_s30  ;;  %s3223_s23 = scalar_lea.sflag [#allocation4], %s669_s30 }
  0xc5   : > { %v3873_v8 = vpack.c.bf16 %v3370_v5, %v3368_v3  ;;  %v3875_v9 = vpack.c.bf16 %v3375_v7, %v3373_v6  ;;  %v3372_v10 = vld [vmem:[%s6378_s2 + $0x60] sm:$0xff]  ;;  %v3374_v11 = vld [vmem:[%s6378_s2 + $0x70] sm:$0xff]  ;;  %v5046_v13 = vld [vmem:[%s5016_s19 + $0x8] sm:$0xff]  ;;  %s3235_s22 = sshll.u32 %s670_s24, 4  ;;  %p6384_p7 = scmp.ne.s32.totalorder %s6382_s20, 0  ;;  %s6273_s22 = int_to_ptr.vmem [resolvable:$true] %s3235_s22 }
  0xc6   : > { %v5043_v12 = vld [vmem:[%s5016_s19] sm:$0xff]  ;;  %3872 = vmatprep.subr.bf16.mxu0 %v3871_v4  ;;  %v681_v14 = vld [vmem:[%s6378_s2 + $0x8] sm:$0xff]  ;;  %v683_v15 = vld [vmem:[%s6378_s2 + $0x18] sm:$0xff]  ;;  %4286 = vmatprep.subr.bf16.mxu1 %v3871_v4  ;;  %v3877_v16 = vpack.c.bf16 %v3374_v11, %v3372_v10  ;;  %v703_v18 = vrot.slane %v5046_v13, 1  ;;  %v915_v52 = vrot.slane %v5046_v13, 2  ;;  %s4610_s29 = scalar_lea.vmem %s6273_s22, 16 }
  0xc7   : > { %3874 = vmatpush1.bf16.msra.mxu0 %v3873_v8  ;;  %v702_v17 = vrot.slane %v5043_v12, 1  ;;  %4288 = vmatpush1.bf16.msra.mxu1 %v3873_v8  ;;  %v3879_v19 = vpack.c.bf16 %v683_v15, %v681_v14  ;;  %v680_v20 = vld [vmem:[%s6378_s2] sm:$0xff]  ;;  %v682_v21 = vld [vmem:[%s6378_s2 + $0x10] sm:$0xff]  ;;  %v685_v23 = vld [vmem:[%s6378_s2 + $0x28] sm:$0xff]  ;;  %v914_v51 = vrot.slane %v5043_v12, 2  ;;  %v1036_v7 = vrot.slane %v5043_v12, 3  ;;  %p4611_p4 = scmp.ne.s32.totalorder %s6273_s22, %s4610_s29 }
  0xc8   : > { %3876 = vmatprep.subr.bf16.mxu0 %v3875_v9  ;;  %v5063_v22 = vld [vmem:[%s5016_s19 + $0x10] sm:$0xff]  ;;  %4287 = vmatprep.subr.bf16.mxu1 %v3875_v9  ;;  %v687_v24 = vld [vmem:[%s6378_s2 + $0x38] sm:$0xff]  ;;  %v3881_v26 = vpack.c.bf16 %v682_v21, %v680_v20  ;;  %v684_v29 = vld [vmem:[%s6378_s2 + $0x20] sm:$0xff]  ;;  %v1037_v8 = vrot.slane %v5046_v13, 3 }
  0xc9   : > { %v704_v25 = vsel %vm701_vm0, %v702_v17, %v703_v18  ;;  %v705_v27 = vrot.slane %v5063_v22, 1  ;;  %v3883_v28 = vpack.c.bf16 %v687_v24, %v685_v23  ;;  %v686_v30 = vld [vmem:[%s6378_s2 + $0x30] sm:$0xff]  ;;  %v3385_v31 = vld [vmem:[%s6378_s2 + $0x88] sm:$0xff]  ;;  %v3387_v32 = vld [vmem:[%s6378_s2 + $0x98] sm:$0xff]  ;;  %v916_v57 = vsel %vm913_vm2, %v914_v51, %v915_v52  ;;  %p4612_p8 = pnand %p4611_p4, %p6384_p7 }
  0xca   : > { %v5086_v33 = vld [vmem:[%s5016_s19 + $0x18] sm:$0xff]  ;;  %v3885_v36 = vpack.c.bf16 %v686_v30, %v684_v29  ;;  %v3887_v37 = vpack.c.bf16 %v3387_v32, %v3385_v31  ;;  %v3384_v38 = vld [vmem:[%s6378_s2 + $0x80] sm:$0xff]  ;;  %v3386_v39 = vld [vmem:[%s6378_s2 + $0x90] sm:$0xff]  ;;  %v917_v58 = vrot.slane %v5063_v22, 2  ;;  %v1038_v15 = vsel %vm1035_vm3, %v1036_v7, %v1037_v8  ;;  %s6380_s19 = sld [smem:[#allocation30_spill]] }
  0xcb   : > { %3878 = vmatpush1.bf16.msra.mxu0 %v3877_v16  ;;  %4289 = vmatpush1.bf16.msra.mxu1 %v3877_v16  ;;  %v707_v34 = vrot.slane %v5086_v33, 1  ;;  %v706_v35 = vsel %vm701_vm0, %v703_v18, %v705_v27  ;;  %v3389_v41 = vld [vmem:[%s6378_s2 + $0xa8] sm:$0xff]  ;;  %v3391_v42 = vld [vmem:[%s6378_s2 + $0xb8] sm:$0xff]  ;;  %v3889_v43 = vpack.c.bf16 %v3386_v39, %v3384_v38  ;;  %v3388_v45 = vld [vmem:[%s6378_s2 + $0xa0] sm:$0xff]  ;;  %v919_v3 = vrot.slane %v5086_v33, 2  ;;  %p4613_p11 = pneg %p4612_p8 }
  0xcc   : > { %3880 = vmatprep.subr.bf16.mxu0 %v3879_v19  ;;  %v3891_v44 = vpack.c.bf16 %v3391_v42, %v3389_v41  ;;  %v3390_v46 = vld [vmem:[%s6378_s2 + $0xb0] sm:$0xff]  ;;  %v3397_v47 = vld [vmem:[%s6378_s2 + $0xc8] sm:$0xff]  ;;  %v3399_v48 = vld [vmem:[%s6378_s2 + $0xd8] sm:$0xff]  ;;  %v918_v2 = vsel %vm913_vm2, %v915_v52, %v917_v58  ;;  %v1039_v16 = vrot.slane %v5063_v22, 3  ;;  %v1041_v23 = vrot.slane %v5086_v33, 3 }
  0xcd   : > { %v708_v40 = vsel %vm701_vm0, %v705_v27, %v707_v34  ;;  %v3893_v49 = vpack.c.bf16 %v3390_v46, %v3388_v45  ;;  %v3895_v50 = vpack.c.bf16 %v3399_v48, %v3397_v47  ;;  %v3396_v53 = vld [vmem:[%s6378_s2 + $0xc0] sm:$0xff]  ;;  %v3398_v54 = vld [vmem:[%s6378_s2 + $0xd0] sm:$0xff]  ;;  %v3401_v55 = vld [vmem:[%s6378_s2 + $0xe8] sm:$0xff]  ;;  %v920_v6 = vsel %vm913_vm2, %v917_v58, %v919_v3 }
  0xce   : > { %3376 = vmatmul.mubr.msk.f32.vlgmr.msra.gmra.mrb[0].mxu0 %vm709_vm1, %v704_v25  ;;  %3378 = vmatmul.mubr.msk.f32.vlgmr.msra.gmra.mrb[0].mxu1 %vm709_vm1, %v708_v40  ;;  %v3403_v56 = vld [vmem:[%s6378_s2 + $0xf8] sm:$0xff]  ;;  %v3897_v59 = vpack.c.bf16 %v3398_v54, %v3396_v53  ;;  %v3400_v61 = vld [vmem:[%s6378_s2 + $0xe0] sm:$0xff]  ;;  %v3402_v62 = vld [vmem:[%s6378_s2 + $0xf0] sm:$0xff]  ;;  %v1040_v21 = vsel %vm1035_vm3, %v1037_v8, %v1039_v16  ;;  %v1042_v25 = vsel %vm1035_vm3, %v1039_v16, %v1041_v23  ;;  %v1159_v27 = vrot.slane %v5046_v13, 4 }
  0xcf   : > { %3882 = vmatpush1.bf16.msra.mxu0 %v3881_v26  ;;  %788 = vmatprep.mubr.f32.mxu0 %v4696_v0  ;;  %v3899_v60 = vpack.c.bf16 %v3403_v56, %v3401_v55  ;;  %v3409_v63 = vld [vmem:[%s6378_s2 + $0x108] sm:$0xff]  ;;  %v3411_v1 = vld [vmem:[%s6378_s2 + $0x118] sm:$0xff]  ;;  %v3901_v4 = vpack.c.bf16 %v3402_v62, %v3400_v61  ;;  %v3408_v9 = vld [vmem:[%s6378_s2 + $0x100] sm:$0xff]  ;;  %v1158_v26 = vrot.slane %v5043_v12, 4  ;;  %v1161_v29 = vrot.slane %v5063_v22, 4 }
  0xd0   : > { %3884 = vmatprep.subr.bf16.mxu0 %v3883_v28  ;;  %800 = vmatprep.mubr.f32.mxu1 %v4696_v0  ;;  %v3903_v5 = vpack.c.bf16 %v3411_v1, %v3409_v63  ;;  %v3410_v10 = vld [vmem:[%s6378_s2 + $0x110] sm:$0xff]  ;;  %v3413_v11 = vld [vmem:[%s6378_s2 + $0x128] sm:$0xff]  ;;  %v3415_v14 = vld [vmem:[%s6378_s2 + $0x138] sm:$0xff]  ;;  %v1163_v31 = vrot.slane %v5086_v33, 4 }
  0xd1   : > { %v3905_v17 = vpack.c.bf16 %v3410_v10, %v3408_v9  ;;  %v3907_v18 = vpack.c.bf16 %v3415_v14, %v3413_v11  ;;  %v3412_v19 = vld [vmem:[%s6378_s2 + $0x120] sm:$0xff]  ;;  %v3414_v20 = vld [vmem:[%s6378_s2 + $0x130] sm:$0xff]  ;;  %v1160_v28 = vsel %vm1157_vm4, %v1158_v26, %v1159_v27  ;;  %v1162_v30 = vsel %vm1157_vm4, %v1159_v27, %v1161_v29  ;;  %v1299_v11 = vld [vmem:[%s6380_s19 + $0x8] sm:$0x3f] }
  0xd2   : > { %3377 = vmatmul.mubr.msk.f32.gmra.mrb[2].mxu0 %vm709_vm1, %v706_v35  ;;  %3379 = vmatmul.mubr.msk.f32.gmra.mrb[2].mxu1 %vm709_vm1, %v707_v34  ;;  %v3909_v24 = vpack.c.bf16 %v3414_v20, %v3412_v19  ;;  %v1272_v35 = vlaneseq  ;;  %v1298_v10 = vld [vmem:[%s6380_s19] sm:$0xff]  ;;  %v1481_v19 = vld [vmem:[%s6318_s5 + $0x10] sm:$0xff]  ;;  %v1482_v20 = vld [vmem:[%s6318_s5 + $0x18] sm:$0xff] }
  0xd3   : > { %3886 = vmatpush1.bf16.msra.mxu0 %v3885_v36  ;;  %879 = vmatprep.mubr.f32.mxu0 %v4696_v0  ;;  %v1479_v14 = vld [vmem:[%s6318_s5] sm:$0xff]  ;;  %v1485_v27 = vld [vmem:[%s6318_s5 + $0x30] sm:$0xff] }
  0xd4   : > { %3888 = vmatprep.subr.bf16.mxu0 %v3887_v37  ;;  %1377 = vmatprep.mubr.f32.mxu1 %v4696_v0  ;;  %v1270_v37 = vld [vmem:[%s6379_s27] sm:$0x3]  ;;  %s3593_s27 = sshll.u32 %s4822_s1, 4  ;;  %s4700_s1 = smov [#allocation13]  }
  0xd5   : > { %v1390_v16 = vld [vmem:[%s6317_s4] sm:$0xff]  ;;  %s6271_s25 = scalar_lea.hbm %s6383_s28, %s3593_s27  ;;  %s4614_s3 = sshll.u32 %s4700_s1, 4  ;;  %s4615_s3 = int_to_ptr.vmem [resolvable:$false] %s4614_s3 }
  0xd6   : > { %3380 = vmatmul.mubr.msk.f32.vlgmr.msra.gmra.mrb[0].mxu0 %vm709_vm1, %v5043_v12  ;;  %v1164_v12 = vsel %vm1157_vm4, %v1161_v29, %v1163_v31  ;;  %s4616_s26 = scalar_lea.vmem %s4615_s3, 32  ;;  %p4617_p13 = scmp.lt.s32.totalorder %s6273_s22, %s4615_s3 }
  0xd7   : > { %885 = vmatprep.mubr.f32.mxu0 %v4696_v0  ;;  %3890 = vmatpush1.bf16.msra.mxu0 %v3889_v43  ;;  %p4618_p1 = scmp.lt.s32.totalorder %s4616_s26, %s4610_s29 }
  0xd8   : > { %3892 = vmatprep.subr.bf16.mxu0 %v3891_v44 }
  0xd9   : > { %p4619_p0 = por %p4618_p1, %p4617_p13 }
  0xda   : > { %3381 = vmatmul.mubr.msk.f32.gmra.mrb[2].mxu0 %vm709_vm1, %v5046_v13 }
  0xdb   : > { %891 = vmatprep.mubr.f32.mxu0 %v4696_v0  ;;  %3894 = vmatpush1.bf16.msra.mxu0 %v3893_v49  ;;  %p4620_p6 = pnand %p4619_p0, %p4613_p11 }
  0xdc   : > { %3896 = vmatprep.subr.bf16.mxu0 %v3895_v50 }
  0xde   : > { %3382 = vmatmul.mubr.msk.f32.gmra.mrb[4].mxu0 %vm709_vm1, %v5063_v22 }
  0xdf   : > { %897 = vmatprep.mubr.f32.mxu0 %v4696_v0 }
  0xe2   : > { %3383 = vmatmul.mubr.msk.f32.gmra.mrb[6].mxu0 %vm709_vm1, %v5086_v33  ;;  %v5222_v33 = vshrl.u32 %v1272_v35, 7  ;;  %v1492_v35 = vld [vmem:[%s6318_s5 + $0x68] sm:$0xff] }
  0xe3   : > { %993 = vmatprep.mubr.f32.mxu0 %v4696_v0 }
  0xe4   : > { %v1274_v36 = vsub.s32 0, %v5222_v33  ;;  %v1278_v38 = vsub.s32 1, %v5222_v33  ;;  %v2276_v33 = vld [vmem:[#allocation5] sm:$0x1f] }
  0xe6   : > { %3392 = vmatmul.mubr.msk.f32.vlgmr.msra.gmra.mrb[0].mxu0 %vm709_vm1, %v916_v57  ;;  %v1275_v39 = vrot.slane %v1270_v37, %v1274_v36  ;;  %v1279_v41 = vrot.slane %v1270_v37, %v1278_v38 }
  0xe7   : > { %999 = vmatprep.mubr.f32.mxu0 %v4696_v0  ;;  %3898 = vmatpush1.bf16.msra.mxu0 %v3897_v59 }
  0xe8   : > { %3900 = vmatprep.subr.bf16.mxu0 %v3899_v60 }
  0xea   : > { %3393 = vmatmul.mubr.msk.f32.gmra.mrb[2].mxu0 %vm709_vm1, %v918_v2 }
  0xeb   : > { %1005 = vmatprep.mubr.f32.mxu0 %v4696_v0  ;;  %3902 = vmatpush1.bf16.msra.mxu0 %v3901_v4 }
  0xec   : > { %3904 = vmatprep.subr.bf16.mxu0 %v3903_v5 }
  0xee   : > { %3394 = vmatmul.mubr.msk.f32.gmra.mrb[4].mxu0 %vm709_vm1, %v920_v6 }
  0xef   : > { %1011 = vmatprep.mubr.f32.mxu0 %v4696_v0 }
  0xf2   : > { %3395 = vmatmul.mubr.msk.f32.gmra.mrb[6].mxu0 %vm709_vm1, %v919_v3 }
  0xf3   : > { %1115 = vmatprep.mubr.f32.mxu0 %v4696_v0 }
  0xf6   : > { %3404 = vmatmul.mubr.msk.f32.vlgmr.msra.gmra.mrb[0].mxu0 %vm709_vm1, %v1038_v15  ;;  %v1480_v15 = vld [vmem:[%s6318_s5 + $0x8] sm:$0xff] }
  0xf7   : > { %1121 = vmatprep.mubr.f32.mxu0 %v4696_v0  ;;  %3906 = vmatpush1.bf16.msra.mxu0 %v3905_v17  ;;  %v3932_v17 = vpack.c.bf16 %v1480_v15, %v1479_v14  ;;  %v1592_v15 = vld [vmem:[%s6319_s6 + $0x50] sm:$0xff] }
  0xf8   : > { %3908 = vmatprep.subr.bf16.mxu0 %v3907_v18  ;;  %v4698_v18 = vmov 0.0|0.0  }
  0xfa   : > { %3405 = vmatmul.mubr.msk.f32.gmra.mrb[2].mxu0 %vm709_vm1, %v1040_v21  ;;  %v1391_v21 = vld [vmem:[%s6317_s4 + $0x8] sm:$0x3f] }
  0xfb   : > { %1127 = vmatprep.mubr.f32.mxu0 %v4696_v0  ;;  %3910 = vmatpush1.bf16.msra.mxu0 %v3909_v24  ;;  %v1483_v24 = vld [vmem:[%s6318_s5 + $0x20] sm:$0xff] }
  0xfe   : > { %3406 = vmatmul.mubr.msk.f32.gmra.mrb[4].mxu0 %vm709_vm1, %v1042_v25  ;;  %v1484_v25 = vld [vmem:[%s6318_s5 + $0x28] sm:$0xff] }
  0xff   : > { %1133 = vmatprep.mubr.f32.mxu0 %v4696_v0  ;;  %v3938_v26 = vpack.c.bf16 %v1484_v25, %v1483_v24  ;;  %v1597_v24 = vld [vmem:[%s6319_s6 + $0x78] sm:$0xff] }
 0x102   : > { %3407 = vmatmul.mubr.msk.f32.gmra.mrb[6].mxu0 %vm709_vm1, %v1041_v23  ;;  %v3935_v23 = vpack.c.bf16 %v1482_v20, %v1481_v19  ;;  %v1594_v19 = vld [vmem:[%s6319_s6 + $0x60] sm:$0xff]  ;;  %v1595_v20 = vld [vmem:[%s6319_s6 + $0x68] sm:$0xff] }
 0x103   : > { %1237 = vmatprep.mubr.f32.mxu0 %v4696_v0 }
 0x106   : > { %3416 = vmatmul.mubr.msk.f32.vlgmr.msra.gmra.mrb[0].mxu0 %vm709_vm1, %v1160_v28  ;;  %v1486_v28 = vld [vmem:[%s6318_s5 + $0x38] sm:$0xff] }
 0x107   : > { %1243 = vmatprep.mubr.f32.mxu0 %v4696_v0  ;;  %v3941_v29 = vpack.c.bf16 %v1486_v28, %v1485_v27  ;;  %v1599_v27 = vld [vmem:[%s6319_s6 + $0x88] sm:$0xff] }
 0x10a   : > { %3417 = vmatmul.mubr.msk.f32.gmra.mrb[2].mxu0 %vm709_vm1, %v1162_v30  ;;  %v1487_v30 = vld [vmem:[%s6318_s5 + $0x40] sm:$0xff] }
 0x10b   : > { %1249 = vmatprep.mubr.f32.mxu0 %v4696_v0 }
 0x10e   : > { %3418 = vmatmul.mubr.msk.f32.gmra.mrb[4].mxu0 %vm709_vm1, %v1164_v12 }
 0x10f   : > { %1255 = vmatprep.mubr.f32.mxu0 %v4696_v0 }
 0x112   : > { %3419 = vmatmul.mubr.msk.f32.gmra.mrb[6].mxu0 %vm709_vm1, %v1163_v31  ;;  %v1488_v31 = vld [vmem:[%s6318_s5 + $0x48] sm:$0xff] }
 0x113   : > { %1805 = vmatprep.mubr.f32.mxu0 %v4696_v0  ;;  %v3944_v12 = vpack.c.bf16 %v1488_v31, %v1487_v30  ;;  %v1601_v30 = vld [vmem:[%s6319_s6 + $0x98] sm:$0xff] }
 0x1a1   : > { %v796_v13 = vpop.f32.mrb[0].mxu1 }
 0x1a2   : > { %v798_v22 = vpop.f32.mrb[1].mxu1 }
 0x1a5   : > { %v802_v32 = vpop.f32.mrb[2].mxu1 }
 0x1a6   : > { %v804_v34 = vpop.f32.mrb[3].mxu1 }
 0x1d9   : > { %v1239_v40 = vpop.f32.mrb[0].mxu0 }
 0x1da   : > { %v1241_v42 = vpop.f32.mrb[1].mxu0  ;;  %v1282_v43 = vadd.f32 %v1275_v39, %v1239_v40  ;;  %v1494_v40 = vld [vmem:[%s6318_s5 + $0x78] sm:$0xff] }
 0x1db   : > { %v1283_v44 = vadd.f32 %v1279_v41, %v1241_v42  ;;  %v1495_v42 = vld [vmem:[%s6318_s5 + $0x80] sm:$0xff] }
 0x1dc   : > { %v1290_v49 = vmax.f32 %v1282_v43, 0.0  ;;  %v1496_v43 = vld [vmem:[%s6318_s5 + $0x88] sm:$0xff] }
 0x1dd   : > { %v1245_v45 = vpop.f32.mrb[2].mxu0  ;;  %v1291_v51 = vmax.f32 %v1283_v44, 0.0  ;;  %v3956_v44 = vpack.c.bf16 %v1496_v43, %v1495_v42  ;;  %v3436_v42 = vld [vmem:[%s6320_s7 + $0xd0] sm:$0xff]  ;;  %v3438_v43 = vld [vmem:[%s6320_s7 + $0xe0] sm:$0xff] }
 0x1de   : > { %v1284_v46 = vadd.f32 %v1275_v39, %v1245_v45  ;;  %v1247_v47 = vpop.f32.mrb[3].mxu0  ;;  %v1497_v45 = vld [vmem:[%s6318_s5 + $0x90] sm:$0xff] }
 0x1df   : > { %v1285_v48 = vadd.f32 %v1279_v41, %v1247_v47 }
 0x1e0   : > { %v1292_v50 = vmax.f32 %v1284_v46, 0.0  ;;  %v1498_v46 = vld [vmem:[%s6318_s5 + $0x98] sm:$0xff] }
 0x1e1   : > { %v1293_v52 = vmax.f32 %v1285_v48, 0.0  ;;  %v1251_v53 = vpop.f32.mrb[4].mxu0  ;;  %v3959_v47 = vpack.c.bf16 %v1498_v46, %v1497_v45  ;;  %v1499_v48 = vld [vmem:[%s6318_s5 + $0xa0] sm:$0xff]  ;;  %v3443_v45 = vld [vmem:[%s6320_s7 + $0x108] sm:$0xff]  ;;  %v3997_v46 = vpack.c.bf16 %v3438_v43, %v3436_v42 }
 0x1e2   : > { %v3913_v54 = vpack.c.bf16 %v1292_v50, %v1290_v49  ;;  %v4290_v55 = vadd.f32 %v1251_v53, %v796_v13  ;;  %v1253_v56 = vpop.f32.mrb[5].mxu0  ;;  %v1489_v13 = vld [vmem:[%s6318_s5 + $0x50] sm:$0xff]  ;;  %v1582_v53 = vld [vmem:[%s6319_s6] sm:$0xff] }
 0x1e3   : > { %v3911_v57 = vpack.c.bf16 %v1293_v52, %v1291_v51  ;;  %v4291_v58 = vadd.f32 %v1253_v56, %v798_v22  ;;  %v1490_v22 = vld [vmem:[%s6318_s5 + $0x58] sm:$0xff]  ;;  %v1688_v43 = vld [vmem:[%s6320_s7 + $0x40] sm:$0xff] }
 0x1e4   : > { %v1286_v60 = vadd.f32 %v4290_v55, %v1275_v39 }
 0x1e5   : > { %v1257_v59 = vpop.f32.mrb[6].mxu0  ;;  %3912 = vmatprep.subr.bf16.mxu1 %v3911_v57  ;;  %v1287_v63 = vadd.f32 %v4291_v58, %v1279_v41 }
 0x1e6   : > { %v4292_v61 = vadd.f32 %v1257_v59, %v802_v32  ;;  %v1259_v62 = vpop.f32.mrb[7].mxu0  ;;  %3914 = vmatpush1.bf16.msra.mxu1 %v3913_v54  ;;  %v1294_v4 = vmax.f32 %v1286_v60, 0.0  ;;  %v3947_v32 = vpack.c.bf16 %v1490_v22, %v1489_v13  ;;  %v1584_v60 = vld [vmem:[%s6319_s6 + $0x10] sm:$0xff]  ;;  %v3433_v13 = vld [vmem:[%s6320_s7 + $0xb8] sm:$0xff]  ;;  %v3435_v22 = vld [vmem:[%s6320_s7 + $0xc8] sm:$0xff] }
 0x1e7   : > { %v4293_v1 = vadd.f32 %v1259_v62, %v804_v34  ;;  %v1295_v6 = vmax.f32 %v1287_v63, 0.0  ;;  %v1491_v34 = vld [vmem:[%s6318_s5 + $0x60] sm:$0xff] }
 0x1e8   : > { %v1288_v2 = vadd.f32 %v4292_v61, %v1275_v39  ;;  %v3950_v37 = vpack.c.bf16 %v1492_v35, %v1491_v34  ;;  %v1493_v39 = vld [vmem:[%s6318_s5 + $0x70] sm:$0xff]  ;;  %v1585_v61 = vld [vmem:[%s6319_s6 + $0x18] sm:$0xff]  ;;  %v3991_v34 = vpack.c.bf16 %v3435_v22, %v3433_v13  ;;  %v3434_v35 = vld [vmem:[%s6320_s7 + $0xc0] sm:$0xff] }
 0x1e9   : > { %v1289_v3 = vadd.f32 %v4293_v1, %v1279_v41  ;;  %v3953_v41 = vpack.c.bf16 %v1494_v40, %v1493_v39  ;;  %v3439_v39 = vld [vmem:[%s6320_s7 + $0xe8] sm:$0xff]  ;;  %v1684_v13 = vld [vmem:[%s6320_s7 + $0x20] sm:$0xff]  ;;  %v1686_v22 = vld [vmem:[%s6320_s7 + $0x30] sm:$0xff] }
 0x1ea   : > { %v1296_v5 = vmax.f32 %v1288_v2, 0.0  ;;  %3992 = vmatprep.subr.bf16.mxu0 %v3991_v34  ;;  %v1689_v34 = vld [vmem:[%s6320_s7 + $0x48] sm:$0xff] }
 0x1eb   : > { %v1297_v7 = vmax.f32 %v1289_v3, 0.0  ;;  %v3965_v3 = vpack.c.bf16 %v1585_v61, %v1584_v60  ;;  %v3448_v60 = vld [vmem:[%s6320_s7 + $0x130] sm:$0xff]  ;;  %v3450_v61 = vld [vmem:[%s6320_s7 + $0x140] sm:$0xff] }
 0x1ec   : > { %v3918_v8 = vpack.c.bf16 %v1296_v5, %v1294_v4  ;;  %v1586_v4 = vld [vmem:[%s6319_s6 + $0x20] sm:$0xff]  ;;  %v1587_v5 = vld [vmem:[%s6319_s6 + $0x28] sm:$0xff] }
 0x1ed   : > { %v3915_v9 = vpack.c.bf16 %v1297_v7, %v1295_v6  ;;  %v3968_v6 = vpack.c.bf16 %v1587_v5, %v1586_v4  ;;  %v1588_v7 = vld [vmem:[%s6319_s6 + $0x30] sm:$0xff] }
 0x1ef   : > { %3917 = vmatprep.subr.msk.bf16.mxu1 %vm3916_vm6, %v3915_v9 }
 0x1f0   : > { %3920 = vmatpush1.bf16.msk.msra.mxu1 %vm3916_vm6, %v3918_v8 }
 0x1f1   : > { %3922 = vmatprep.subr.bf16.mxu1 %v3911_v57 }
 0x1f3   : > { %3422 = vmatmul.mubr.msk.f32.vlgmr.msra.gmra.mrb[4].mxu1 %vm1300_vm7, %v1298_v10  ;;  %v1590_v10 = vld [vmem:[%s6319_s6 + $0x40] sm:$0xff] }
 0x1f4   : > { %3924 = vmatpush1.bf16.msra.mxu1 %v3913_v54  ;;  %1383 = vmatprep.mubr.f32.mxu1 %v4696_v0  ;;  %v1583_v54 = vld [vmem:[%s6319_s6 + $0x8] sm:$0xff] }
 0x1f5   : > { %3927 = vmatprep.subr.msk.bf16.mxu1 %vm3916_vm6, %v3915_v9  ;;  %v3962_v59 = vpack.c.bf16 %v1583_v54, %v1582_v53  ;;  %v3444_v54 = vld [vmem:[%s6320_s7 + $0x110] sm:$0xff] }
 0x1f7   : > { %3423 = vmatmul.mubr.msk.f32.gmra.mrb[6].mxu1 %vm1300_vm7, %v1299_v11  ;;  %v1591_v11 = vld [vmem:[%s6319_s6 + $0x48] sm:$0xff] }
 0x1f8   : > { %3930 = vmatpush1.bf16.msk.msra.mxu1 %vm3916_vm6, %v3918_v8  ;;  %1462 = vmatprep.mubr.f32.mxu1 %v4696_v0  ;;  %v1589_v8 = vld [vmem:[%s6319_s6 + $0x38] sm:$0xff]  ;;  %v3974_v14 = vpack.c.bf16 %v1591_v11, %v1590_v10 }
 0x1f9   : > { %3931 = vmatprep.subr.bf16.mxu1 %v4698_v18  ;;  %v3971_v9 = vpack.c.bf16 %v1589_v8, %v1588_v7 }
 0x1fb   : > { %3426 = vmatmul.mubr.msk.f32.vlgmr.msra.gmra.mrb[8].mxu1 %vm1300_vm7, %v1390_v16  ;;  %v1593_v16 = vld [vmem:[%s6319_s6 + $0x58] sm:$0xff] }
 0x1fc   : > { %1468 = vmatprep.mubr.f32.mxu1 %v4696_v0  ;;  %3933 = vmatpush1.bf16.msra.mxu1 %v3932_v17  ;;  %v3977_v17 = vpack.c.bf16 %v1593_v16, %v1592_v15  ;;  %v1682_v15 = vld [vmem:[%s6320_s7 + $0x10] sm:$0xff] }
 0x1fd   : > { %3934 = vmatprep.subr.bf16.mxu1 %v4698_v18 }
 0x1ff   : > { %3427 = vmatmul.mubr.msk.f32.gmra.mrb[10].mxu1 %vm1300_vm7, %v1391_v21  ;;  %v3980_v21 = vpack.c.bf16 %v1595_v20, %v1594_v19 }
 0x200   : > { %3936 = vmatpush1.bf16.msra.mxu1 %v3935_v23  ;;  %v1596_v23 = vld [vmem:[%s6319_s6 + $0x70] sm:$0xff] }
 0x201   : > { %3937 = vmatprep.subr.bf16.mxu1 %v4698_v18  ;;  %v3983_v25 = vpack.c.bf16 %v1597_v24, %v1596_v23  ;;  %v1687_v23 = vld [vmem:[%s6320_s7 + $0x38] sm:$0xff] }
 0x204   : > { %3939 = vmatpush1.bf16.msra.mxu1 %v3938_v26  ;;  %v1598_v26 = vld [vmem:[%s6319_s6 + $0x80] sm:$0xff] }
 0x205   : > { %3940 = vmatprep.subr.bf16.mxu1 %v4698_v18  ;;  %v3986_v28 = vpack.c.bf16 %v1599_v27, %v1598_v26 }
 0x208   : > { %3942 = vmatpush1.bf16.msra.mxu1 %v3941_v29  ;;  %v1600_v29 = vld [vmem:[%s6319_s6 + $0x90] sm:$0xff] }
 0x209   : > { %3943 = vmatprep.subr.bf16.mxu1 %v4698_v18  ;;  %v3989_v31 = vpack.c.bf16 %v1601_v30, %v1600_v29 }
 0x20c   : > { %3945 = vmatpush1.bf16.msra.mxu1 %v3944_v12  ;;  %v1602_v12 = vld [vmem:[%s6319_s6 + $0xa0] sm:$0xff] }
 0x20d   : > { %3946 = vmatprep.subr.bf16.mxu1 %v4698_v18 }
 0x210   : > { %3948 = vmatpush1.bf16.msra.mxu1 %v3947_v32  ;;  %v3432_v32 = vld [vmem:[%s6320_s7 + $0xb0] sm:$0xff] }
 0x211   : > { %3949 = vmatprep.subr.bf16.mxu1 %v4698_v18  ;;  %v3993_v40 = vpack.c.bf16 %v3434_v35, %v3432_v32  ;;  %v1691_v35 = vld [vmem:[%s6320_s7 + $0x58] sm:$0xff] }
 0x212   : > { %v4019_v42 = vpack.c.bf16 %v1691_v35, %v1689_v34  ;;  %v3489_v34 = vld [vmem:[%s6320_s7 + $0x218] sm:$0xff]  ;;  %v3491_v35 = vld [vmem:[%s6320_s7 + $0x228] sm:$0xff] }
 0x213   : > { %3994 = vmatpush1.bf16.msra.mxu0 %v3993_v40 }
 0x214   : > { %3951 = vmatpush1.bf16.msra.mxu1 %v3950_v37  ;;  %v3437_v37 = vld [vmem:[%s6320_s7 + $0xd8] sm:$0xff] }
 0x215   : > { %3952 = vmatprep.subr.bf16.mxu1 %v4698_v18 }
 0x218   : > { %3954 = vmatpush1.bf16.msra.mxu1 %v3953_v41  ;;  %v3995_v41 = vpack.c.bf16 %v3439_v39, %v3437_v37 }
 0x219   : > { %3955 = vmatprep.subr.bf16.mxu1 %v4698_v18 }
 0x21a   : > { %3996 = vmatprep.subr.bf16.mxu0 %v3995_v41  ;;  %v4017_v41 = vpack.c.bf16 %v1686_v22, %v1684_v13  ;;  %v3480_v13 = vld [vmem:[%s6320_s7 + $0x1f0] sm:$0xff] }
 0x21b   : > { %3998 = vmatpush1.bf16.msra.mxu0 %v3997_v46  ;;  %v1695_v46 = vld [vmem:[%s6320_s7 + $0x78] sm:$0xff] }
 0x21c   : > { %3957 = vmatpush1.bf16.msra.mxu1 %v3956_v44  ;;  %v3441_v44 = vld [vmem:[%s6320_s7 + $0xf8] sm:$0xff] }
 0x21d   : > { %3958 = vmatprep.subr.bf16.mxu1 %v4698_v18 }
 0x220   : > { %3960 = vmatpush1.bf16.msra.mxu1 %v3959_v47  ;;  %v3999_v47 = vpack.c.bf16 %v3443_v45, %v3441_v44  ;;  %v1690_v44 = vld [vmem:[%s6320_s7 + $0x50] sm:$0xff]  ;;  %v1693_v45 = vld [vmem:[%s6320_s7 + $0x68] sm:$0xff] }
 0x221   : > { %1547 = vmatprep.subr.mxu1 %v4696_v0 }
 0x222   : > { %4000 = vmatprep.subr.bf16.mxu0 %v3999_v47  ;;  %v4021_v47 = vpack.c.bf16 %v1690_v44, %v1688_v43  ;;  %v3493_v43 = vld [vmem:[%s6320_s7 + $0x238] sm:$0xff]  ;;  %v3495_v44 = vld [vmem:[%s6320_s7 + $0x248] sm:$0xff] }
 0x224   : > { %1548 = vmatpush1.msra.mxu1 %v1499_v48  ;;  %v3440_v48 = vld [vmem:[%s6320_s7 + $0xf0] sm:$0xff] }
 0x225   : > { %3961 = vmatprep.subr.bf16.mxu1 %v4698_v18 }
 0x2c6   : > { %v1379_v49 = vpop.f32.mrb[4].mxu1 }
 0x2c7   : > { %v1381_v50 = vpop.f32.mrb[5].mxu1 }
 0x2ca   : > { %v1385_v51 = vpop.f32.mrb[6].mxu1 }
 0x2cb   : > { %v1387_v52 = vpop.f32.mrb[7].mxu1 }
 0x2ce   : > { %v1464_v55 = vpop.f32.mrb[8].mxu1 }
 0x2cf   : > { %v1475_v56 = vmax.f32 %v1379_v49, %v1464_v55  ;;  %v1466_v57 = vpop.f32.mrb[9].mxu1  ;;  %v3442_v49 = vld [vmem:[%s6320_s7 + $0x100] sm:$0xff] }
 0x2d0   : > { %v1476_v58 = vmax.f32 %v1381_v50, %v1466_v57  ;;  %v3445_v50 = vld [vmem:[%s6320_s7 + $0x118] sm:$0xff]  ;;  %v3446_v55 = vld [vmem:[%s6320_s7 + $0x120] sm:$0xff] }
 0x2d1   : > { %v3449_v57 = vld [vmem:[%s6320_s7 + $0x138] sm:$0xff] }
 0x2d2   : > { %v1470_v62 = vpop.f32.mrb[10].mxu1  ;;  %3428 = vmatprep.mubr.msk.f32.mxu1 %vm1500_vm8, %v1476_v58 }
 0x2d3   : > { %v1477_v63 = vmax.f32 %v1385_v51, %v1470_v62  ;;  %v1472_v1 = vpop.f32.mrb[11].mxu1  ;;  %1572 = vmatmul.mubr.f32.vlgmr.msra.gmra.mrb[12].mxu1 %v1475_v56  ;;  %v3447_v51 = vld [vmem:[%s6320_s7 + $0x128] sm:$0xff]  ;;  %v4009_v62 = vpack.c.bf16 %v3450_v61, %v3448_v60  ;;  %v3465_v60 = vld [vmem:[%s6320_s7 + $0x178] sm:$0xff]  ;;  %v3462_v61 = vld [vmem:[%s6320_s7 + $0x160] sm:$0xff] }
 0x2d4   : > { %v1478_v2 = vmax.f32 %v1387_v52, %v1472_v1  ;;  %3963 = vmatpush1.bf16.msra.mxu1 %v3962_v59  ;;  %v4001_v52 = vpack.c.bf16 %v3442_v49, %v3440_v48  ;;  %v4003_v53 = vpack.c.bf16 %v3447_v51, %v3445_v50  ;;  %v3452_v1 = vld [vmem:[%s6320_s7 + $0x150] sm:$0xf]  ;;  %v4023_v48 = vpack.c.bf16 %v1695_v46, %v1693_v45  ;;  %v1692_v49 = vld [vmem:[%s6320_s7 + $0x60] sm:$0xff]  ;;  %v1697_v51 = vld [vmem:[%s6320_s7 + $0x88] sm:$0xff] }
 0x2d5   : > { %3964 = vmatprep.subr.bf16.mxu1 %v4698_v18  ;;  %v1694_v50 = vld [vmem:[%s6320_s7 + $0x70] sm:$0xff]  ;;  %v3482_v45 = vld [vmem:[%s6320_s7 + $0x200] sm:$0xf]  ;;  %v4051_v46 = vpack.c.bf16 %v3491_v35, %v3489_v34  ;;  %v3531_v35 = vld [vmem:[%s6320_s7 + $0x348] sm:$0xff] }
 0x2d6   : > { %3429 = vmatprep.mubr.msk.f32.mxu1 %vm1500_vm8, %v1478_v2  ;;  %4002 = vmatpush1.bf16.msra.mxu0 %v4001_v52  ;;  %v1699_v52 = vld [vmem:[%s6320_s7 + $0x98] sm:$0xff]  ;;  %v3528_v34 = vld [vmem:[%s6320_s7 + $0x330] sm:$0xff] }
 0x2d7   : > { %1577 = vmatmul.mubr.f32.gmra.mrb[14].mxu1 %v1477_v63  ;;  %4004 = vmatprep.subr.bf16.mxu0 %v4003_v53  ;;  %v4025_v53 = vpack.c.bf16 %v1694_v50, %v1692_v49  ;;  %v3492_v49 = vld [vmem:[%s6320_s7 + $0x230] sm:$0xff]  ;;  %v3494_v50 = vld [vmem:[%s6320_s7 + $0x240] sm:$0xff] }
 0x2d8   : > { %3966 = vmatpush1.bf16.msra.mxu1 %v3965_v3  ;;  %3430 = vmatprep.mubr.msk.f32.mxu1 %vm1500_vm8, %v1476_v58  ;;  %v3451_v58 = vld [vmem:[%s6320_s7 + $0x148] sm:$0xff]  ;;  %v1683_v3 = vld [vmem:[%s6320_s7 + $0x18] sm:$0xff] }
 0x2d9   : > { %3967 = vmatprep.subr.bf16.mxu1 %v4698_v18  ;;  %v4007_v59 = vpack.c.bf16 %v3451_v58, %v3449_v57  ;;  %v1701_v58 = vld [vmem:[%s6320_s7 + $0xa8] sm:$0xf] }
 0x2dc   : > { %3969 = vmatpush1.bf16.msra.mxu1 %v3968_v6 }
 0x2dd   : > { %3970 = vmatprep.subr.bf16.mxu1 %v4698_v18 }
 0x2e0   : > { %3972 = vmatpush1.bf16.msra.mxu1 %v3971_v9 }
 0x2e1   : > { %3973 = vmatprep.subr.bf16.mxu1 %v4698_v18 }
 0x2e4   : > { %3975 = vmatpush1.bf16.msra.mxu1 %v3974_v14  ;;  %v1680_v14 = vld [vmem:[%s6320_s7] sm:$0xff] }
 0x2e5   : > { %3976 = vmatprep.subr.bf16.mxu1 %v4698_v18  ;;  %v4013_v20 = vpack.c.bf16 %v1682_v15, %v1680_v14  ;;  %v3470_v15 = vld [vmem:[%s6320_s7 + $0x1a0] sm:$0xff] }
 0x2e8   : > { %3978 = vmatpush1.bf16.msra.mxu1 %v3977_v17 }
 0x2e9   : > { %3979 = vmatprep.subr.bf16.mxu1 %v4698_v18 }
 0x2ec   : > { %3981 = vmatpush1.bf16.msra.mxu1 %v3980_v21  ;;  %v1685_v21 = vld [vmem:[%s6320_s7 + $0x28] sm:$0xff] }
 0x2ed   : > { %3982 = vmatprep.subr.bf16.mxu1 %v4698_v18 }
 0x2f0   : > { %3984 = vmatpush1.bf16.msra.mxu1 %v3983_v25 }
 0x2f1   : > { %3985 = vmatprep.subr.bf16.mxu1 %v4698_v18 }
 0x2f4   : > { %3987 = vmatpush1.bf16.msra.mxu1 %v3986_v28 }
 0x2f5   : > { %3988 = vmatprep.subr.bf16.mxu1 %v4698_v18 }
 0x2f8   : > { %3990 = vmatpush1.bf16.msra.mxu1 %v3989_v31 }
 0x2f9   : > { %1643 = vmatprep.subr.mxu1 %v4696_v0 }
 0x2fc   : > { %1644 = vmatpush1.msra.mxu1 %v1602_v12  ;;  %v4015_v12 = vpack.c.bf16 %v1687_v23, %v1685_v21  ;;  %v3474_v23 = vld [vmem:[%s6320_s7 + $0x1c0] sm:$0xff] }
 0x2fd   : > { %1668 = vmatmul.mubr.f32.vlgmr.msra.gmra.mrb[16].mxu1 %v1475_v56  ;;  %v4005_v56 = vpack.c.bf16 %v3446_v55, %v3444_v54  ;;  %v4027_v54 = vpack.c.bf16 %v1699_v52, %v1697_v51  ;;  %v1696_v55 = vld [vmem:[%s6320_s7 + $0x80] sm:$0xff]  ;;  %v3497_v51 = vld [vmem:[%s6320_s7 + $0x258] sm:$0xff]  ;;  %v3499_v52 = vld [vmem:[%s6320_s7 + $0x268] sm:$0xff] }
 0x2fe   : > { %3431 = vmatprep.mubr.msk.f32.mxu1 %vm1500_vm8, %v1478_v2  ;;  %v1681_v2 = vld [vmem:[%s6320_s7 + $0x8] sm:$0xff] }
 0x2ff   : > { %4006 = vmatpush1.bf16.msra.mxu0 %v4005_v56  ;;  %v4011_v4 = vpack.c.bf16 %v1683_v3, %v1681_v2  ;;  %v1698_v56 = vld [vmem:[%s6320_s7 + $0x90] sm:$0xff]  ;;  %v1700_v2 = vld [vmem:[%s6320_s7 + $0xa0] sm:$0xf] }
 0x300   : > { %4008 = vmatprep.subr.bf16.mxu0 %v4007_v59  ;;  %v4029_v57 = vpack.c.bf16 %v1698_v56, %v1696_v55  ;;  %v3463_v59 = vld [vmem:[%s6320_s7 + $0x168] sm:$0xff]  ;;  %v3496_v55 = vld [vmem:[%s6320_s7 + $0x250] sm:$0xff]  ;;  %v3498_v56 = vld [vmem:[%s6320_s7 + $0x260] sm:$0xff] }
 0x301   : > { %1673 = vmatmul.mubr.f32.gmra.mrb[18].mxu1 %v1477_v63  ;;  %v3453_v63 = vld [vmem:[%s6320_s7 + $0x158] sm:$0xf]  ;;  %v4031_v3 = vpack.c.bf16 %v3465_v60, %v3463_v59  ;;  %v3500_v60 = vld [vmem:[%s6320_s7 + $0x270] sm:$0xff] }
 0x302   : > { %2352 = vmatprep.mubr.f32.mxu1 %v4696_v0 }
 0x303   : > { %4010 = vmatpush1.bf16.msra.mxu0 %v4009_v62  ;;  %v3464_v62 = vld [vmem:[%s6320_s7 + $0x170] sm:$0xff] }
 0x304   : > { %3454 = vmatprep.subr.msk.mxu0 %vm1157_vm4, %v3453_v63  ;;  %v3467_v63 = vld [vmem:[%s6320_s7 + $0x188] sm:$0xff] }
 0x307   : > { %3455 = vmatpush1.msk.msra.mxu0 %vm1157_vm4, %v3452_v1  ;;  %v3469_v1 = vld [vmem:[%s6320_s7 + $0x198] sm:$0xff] }
 0x308   : > { %4012 = vmatprep.subr.bf16.mxu0 %v4011_v4  ;;  %v4033_v4 = vpack.c.bf16 %v3464_v62, %v3462_v61  ;;  %v3502_v61 = vld [vmem:[%s6320_s7 + $0x280] sm:$0xff]  ;;  %v3505_v62 = vld [vmem:[%s6320_s7 + $0x298] sm:$0xff] }
 0x3a6   : > { %v1573_v5 = vpop.f32.mrb[12].mxu1 }
 0x3a7   : > { %v1575_v6 = vpop.f32.mrb[13].mxu1 }
 0x3a8   : > { %v3466_v6 = vld [vmem:[%s6320_s7 + $0x180] sm:$0xff] }
 0x3aa   : > { %v1578_v7 = vpop.f32.mrb[14].mxu1 }
 0x3ab   : > { %v1580_v8 = vpop.f32.mrb[15].mxu1 }
 0x3ac   : > { %v3471_v8 = vld [vmem:[%s6320_s7 + $0x1a8] sm:$0xff] }
 0x3d0   : > { %v1669_v9 = vpop.f32.mrb[16].mxu1 }
 0x3d1   : > { %v5481_v10 = vmax.f32 %v1573_v5, %v1669_v9  ;;  %v1671_v11 = vpop.f32.mrb[17].mxu1  ;;  %v4035_v5 = vpack.c.bf16 %v3469_v1, %v3467_v63  ;;  %v3473_v9 = vld [vmem:[%s6320_s7 + $0x1b8] sm:$0xff]  ;;  %v4065_v63 = vpack.c.bf16 %v3502_v61, %v3500_v60  ;;  %v2437_v60 = vld [vmem:[%s6324_s11 + $0x8] sm:$0xff] }
 0x3d2   : > { %v4039_v14 = vpack.c.bf16 %v3473_v9, %v3471_v8  ;;  %v3514_v8 = vld [vmem:[%s6320_s7 + $0x2c0] sm:$0xff]  ;;  %v3516_v9 = vld [vmem:[%s6320_s7 + $0x2d0] sm:$0xff]  ;;  %v2359_v61 = vld [vmem:[#allocation7] sm:$0x1f] }
 0x3d3   : > { %v1727_v24 = vrot.slane %v5481_v10, 1  ;;  %v1928_v25 = vrot.slane %v5481_v10, 2  ;;  %v2045_v26 = vrot.slane %v5481_v10, 3  ;;  %v2162_v27 = vrot.slane %v5481_v10, 4 }
 0x3d4   : > { %v1674_v16 = vpop.f32.mrb[18].mxu1 }
 0x3d5   : > { %v5489_v17 = vmax.f32 %v1578_v7, %v1674_v16  ;;  %v1676_v19 = vpop.f32.mrb[19].mxu1  ;;  %v3468_v7 = vld [vmem:[%s6320_s7 + $0x190] sm:$0xff] }
 0x3d6   : > { %v4037_v11 = vpack.c.bf16 %v3468_v7, %v3466_v6  ;;  %v3472_v16 = vld [vmem:[%s6320_s7 + $0x1b0] sm:$0xff]  ;;  %v3475_v19 = vld [vmem:[%s6320_s7 + $0x1c8] sm:$0xff]  ;;  %v3517_v7 = vld [vmem:[%s6320_s7 + $0x2d8] sm:$0xff] }
 0x3d7   : > { %v1728_v28 = vrot.slane %v5489_v17, 1  ;;  %v1929_v29 = vrot.slane %v5489_v17, 2  ;;  %v2046_v30 = vrot.slane %v5489_v17, 3  ;;  %v2163_v31 = vrot.slane %v5489_v17, 4  ;;  %v3515_v6 = vld [vmem:[%s6320_s7 + $0x2c8] sm:$0xff] }
 0x3d9   : > { %v1729_v32 = vsel %vm701_vm0, %v1727_v24, %v1728_v28  ;;  %v5521_v37 = vsel %vm913_vm2, %v1928_v25, %v1929_v29  ;;  %v5526_v39 = vsel %vm1035_vm3, %v2045_v26, %v2046_v30  ;;  %v5531_v40 = vsel %vm1157_vm4, %v2162_v27, %v2163_v31  ;;  %v3476_v24 = vld [vmem:[%s6320_s7 + $0x1d0] sm:$0xff]  ;;  %v3479_v25 = vld [vmem:[%s6320_s7 + $0x1e8] sm:$0xff]  ;;  %v3481_v26 = vld [vmem:[%s6320_s7 + $0x1f8] sm:$0xff] }
 0x3da   : > { %3456 = vmatmul.mubr.msk.f32.vlgmr.msra.gmra.mrb[8].mxu0 %vm1730_vm9, %v1729_v32  ;;  %v4045_v27 = vpack.c.bf16 %v3476_v24, %v3474_v23  ;;  %v3483_v32 = vld [vmem:[%s6320_s7 + $0x208] sm:$0xf]  ;;  %v3525_v24 = vld [vmem:[%s6320_s7 + $0x318] sm:$0xff] }
 0x3db   : > { %4014 = vmatpush1.bf16.msra.mxu0 %v4013_v20  ;;  %1811 = vmatprep.mubr.f32.mxu0 %v4696_v0  ;;  %v4041_v20 = vpack.c.bf16 %v3472_v16, %v3470_v15  ;;  %v3508_v15 = vld [vmem:[%s6320_s7 + $0x2b0] sm:$0xf]  ;;  %v4071_v16 = vpack.c.bf16 %v3517_v7, %v3515_v6  ;;  %v3523_v23 = vld [vmem:[%s6320_s7 + $0x308] sm:$0xff]  ;;  %v2443_v6 = vld [vmem:[%s6324_s11 + $0x38] sm:$0xff] }
 0x3dc   : > { %4016 = vmatprep.subr.bf16.mxu0 %v4015_v12  ;;  %v3478_v12 = vld [vmem:[%s6320_s7 + $0x1e0] sm:$0xff] }
 0x3dd   : > { %v4049_v22 = vpack.c.bf16 %v3480_v13, %v3478_v12  ;;  %v3527_v12 = vld [vmem:[%s6320_s7 + $0x328] sm:$0xff] }
 0x3de   : > { %3457 = vmatmul.mubr.msk.f32.gmra.mrb[10].mxu0 %vm1730_vm9, %v1728_v28  ;;  %v4047_v28 = vpack.c.bf16 %v3481_v26, %v3479_v25  ;;  %v4079_v26 = vpack.c.bf16 %v3525_v24, %v3523_v23  ;;  %v2451_v23 = vld [vmem:[%s6324_s11 + $0x78] sm:$0xff] }
 0x3df   : > { %4018 = vmatpush1.bf16.msra.mxu0 %v4017_v41  ;;  %1892 = vmatprep.mubr.f32.mxu0 %v4696_v0  ;;  %v3488_v41 = vld [vmem:[%s6320_s7 + $0x210] sm:$0xff] }
 0x3e0   : > { %4020 = vmatprep.subr.bf16.mxu0 %v4019_v42  ;;  %v3490_v42 = vld [vmem:[%s6320_s7 + $0x220] sm:$0xff] }
 0x3e3   : > { %4022 = vmatpush1.bf16.msra.mxu0 %v4021_v47  ;;  %v4053_v47 = vpack.c.bf16 %v3490_v42, %v3488_v41 }
 0x3e4   : > { %4024 = vmatprep.subr.bf16.mxu0 %v4023_v48  ;;  %v4055_v48 = vpack.c.bf16 %v3495_v44, %v3493_v43  ;;  %v3530_v43 = vld [vmem:[%s6320_s7 + $0x340] sm:$0xff]  ;;  %v3532_v44 = vld [vmem:[%s6320_s7 + $0x350] sm:$0xff] }
 0x3e7   : > { %4026 = vmatpush1.bf16.msra.mxu0 %v4025_v53  ;;  %v4057_v53 = vpack.c.bf16 %v3494_v50, %v3492_v49 }
 0x3e8   : > { %4028 = vmatprep.subr.bf16.mxu0 %v4027_v54  ;;  %v4059_v54 = vpack.c.bf16 %v3499_v52, %v3497_v51 }
 0x3eb   : > { %4030 = vmatpush1.bf16.msra.mxu0 %v4029_v57  ;;  %v3501_v57 = vld [vmem:[%s6320_s7 + $0x278] sm:$0xff] }
 0x3ec   : > { %3458 = vmatprep.subr.msk.mxu0 %vm1157_vm4, %v1701_v58  ;;  %v4061_v58 = vpack.c.bf16 %v3498_v56, %v3496_v55 }
 0x3ef   : > { %3459 = vmatpush1.msk.msra.mxu0 %vm1157_vm4, %v1700_v2  ;;  %v3504_v2 = vld [vmem:[%s6320_s7 + $0x290] sm:$0xff] }
 0x3f0   : > { %3460 = vmatmul.mubr.msk.f32.vlgmr.msra.gmra.mrb[8].mxu0 %vm1730_vm9, %v5481_v10  ;;  %4032 = vmatprep.subr.bf16.mxu0 %v4031_v3  ;;  %v3477_v10 = vld [vmem:[%s6320_s7 + $0x1d8] sm:$0xff]  ;;  %v3506_v3 = vld [vmem:[%s6320_s7 + $0x2a0] sm:$0xff] }
 0x3f1   : > { %4034 = vmatpush1.bf16.msra.mxu0 %v4033_v4  ;;  %1898 = vmatprep.mubr.f32.mxu0 %v4696_v0  ;;  %v4043_v21 = vpack.c.bf16 %v3477_v10, %v3475_v19  ;;  %v4069_v4 = vpack.c.bf16 %v3506_v3, %v3504_v2  ;;  %v4073_v19 = vpack.c.bf16 %v3516_v9, %v3514_v8  ;;  %v2440_v2 = vld [vmem:[%s6324_s11 + $0x20] sm:$0xff]  ;;  %v2441_v3 = vld [vmem:[%s6324_s11 + $0x28] sm:$0xff] }
 0x3f2   : > { %4036 = vmatprep.subr.bf16.mxu0 %v4035_v5  ;;  %v3509_v5 = vld [vmem:[%s6320_s7 + $0x2b8] sm:$0xf]  ;;  %v2444_v8 = vld [vmem:[%s6324_s11 + $0x40] sm:$0xff]  ;;  %v2445_v9 = vld [vmem:[%s6324_s11 + $0x48] sm:$0xff] }
 0x3f4   : > { %3461 = vmatmul.mubr.msk.f32.gmra.mrb[10].mxu0 %vm1730_vm9, %v5489_v17 }
 0x3f5   : > { %4038 = vmatpush1.bf16.msra.mxu0 %v4037_v11  ;;  %2005 = vmatprep.mubr.f32.mxu0 %v4696_v0  ;;  %v3519_v11 = vld [vmem:[%s6320_s7 + $0x2e8] sm:$0xff] }
 0x3f6   : > { %4040 = vmatprep.subr.bf16.mxu0 %v4039_v14  ;;  %v3521_v14 = vld [vmem:[%s6320_s7 + $0x2f8] sm:$0xff] }
 0x3f7   : > { %v4075_v10 = vpack.c.bf16 %v3521_v14, %v3519_v11  ;;  %v4116_v11 = vpack.c.bf16 %v2445_v9, %v2444_v8  ;;  %v2446_v14 = vld [vmem:[%s6324_s11 + $0x50] sm:$0xff]  ;;  %v3550_v8 = vld [vmem:[%s6326_s13 + $0x60] sm:$0xff]  ;;  %v3551_v9 = vld [vmem:[%s6326_s13 + $0x68] sm:$0xff] }
 0x3f9   : > { %4042 = vmatpush1.bf16.msra.mxu0 %v4041_v20  ;;  %v3518_v20 = vld [vmem:[%s6320_s7 + $0x2e0] sm:$0xff] }
 0x3fa   : > { %4044 = vmatprep.subr.bf16.mxu0 %v4043_v21  ;;  %v3520_v21 = vld [vmem:[%s6320_s7 + $0x2f0] sm:$0xff] }
 0x3fb   : > { %v4077_v25 = vpack.c.bf16 %v3520_v21, %v3518_v20  ;;  %v2450_v21 = vld [vmem:[%s6324_s11 + $0x70] sm:$0xff] }
 0x3fc   : > { %v4125_v24 = vpack.c.bf16 %v2451_v23, %v2450_v21  ;;  %v2626_v23 = vld [vmem:[%s6326_s13 + $0x30] sm:$0xff] }
 0x3fd   : > { %4046 = vmatpush1.bf16.msra.mxu0 %v4045_v27  ;;  %v3522_v27 = vld [vmem:[%s6320_s7 + $0x300] sm:$0xff] }
 0x3fe   : > { %4048 = vmatprep.subr.bf16.mxu0 %v4047_v28  ;;  %v3524_v28 = vld [vmem:[%s6320_s7 + $0x310] sm:$0xff] }
 0x3ff   : > { %v4081_v13 = vpack.c.bf16 %v3524_v28, %v3522_v27  ;;  %v2454_v28 = vld [vmem:[%s6324_s11 + $0x90] sm:$0xff] }
 0x401   : > { %4050 = vmatpush1.bf16.msra.mxu0 %v4049_v22 }
 0x402   : > { %3484 = vmatprep.subr.msk.mxu0 %vm1157_vm4, %v3483_v32  ;;  %v3526_v32 = vld [vmem:[%s6320_s7 + $0x320] sm:$0xff] }
 0x403   : > { %v4085_v41 = vpack.c.bf16 %v3528_v34, %v3526_v32  ;;  %v2529_v32 = vld [vmem:[%s6325_s12] sm:$0xff]  ;;  %v2530_v34 = vld [vmem:[%s6325_s12 + $0x8] sm:$0xff] }
 0x405   : > { %3485 = vmatpush1.msk.msra.mxu0 %vm1157_vm4, %v3482_v45  ;;  %v4089_v45 = vpack.c.bf16 %v3532_v44, %v3530_v43  ;;  %v4134_v43 = vpack.c.bf16 %v2530_v34, %v2529_v32  ;;  %v2531_v44 = vld [vmem:[%s6325_s12 + $0x10] sm:$0xff]  ;;  %v3557_v32 = vld [vmem:[%s6326_s13 + $0x98] sm:$0xff] }
 0x406   : > { %3486 = vmatmul.mubr.msk.f32.vlgmr.msra.gmra.mrb[8].mxu0 %vm1730_vm9, %v5521_v37  ;;  %4052 = vmatprep.subr.bf16.mxu0 %v4051_v46  ;;  %v3503_v37 = vld [vmem:[%s6320_s7 + $0x288] sm:$0xff] }
 0x407   : > { %4054 = vmatpush1.bf16.msra.mxu0 %v4053_v47  ;;  %2011 = vmatprep.mubr.f32.mxu0 %v4696_v0  ;;  %v4063_v59 = vpack.c.bf16 %v3503_v37, %v3501_v57  ;;  %v3535_v46 = vld [vmem:[%s6320_s7 + $0x368] sm:$0xf]  ;;  %v3534_v47 = vld [vmem:[%s6320_s7 + $0x360] sm:$0xf] }
 0x408   : > { %4056 = vmatprep.subr.bf16.mxu0 %v4055_v48  ;;  %v2256_v48 = vld [vmem:[#allocation2] sm:$0x3] }
 0x409   : > { %v2261_v49 = vrot.slane %v2256_v48, %v1274_v36  ;;  %v2265_v51 = vrot.slane %v2256_v48, %v1278_v38  ;;  %v2436_v38 = vld [vmem:[%s6324_s11] sm:$0xff]  ;;  %v2534_v48 = vld [vmem:[%s6325_s12 + $0x28] sm:$0xff] }
 0x40a   : > { %3487 = vmatmul.mubr.msk.f32.gmra.mrb[10].mxu0 %vm1730_vm9, %v1929_v29  ;;  %v3507_v29 = vld [vmem:[%s6320_s7 + $0x2a8] sm:$0xff] }
 0x40b   : > { %4058 = vmatpush1.bf16.msra.mxu0 %v4057_v53  ;;  %2122 = vmatprep.mubr.f32.mxu0 %v4696_v0  ;;  %v4067_v1 = vpack.c.bf16 %v3507_v29, %v3505_v62  ;;  %v4104_v62 = vpack.c.bf16 %v2437_v60, %v2436_v38  ;;  %v2438_v29 = vld [vmem:[%s6324_s11 + $0x10] sm:$0xff]  ;;  %v2546_v38 = vld [vmem:[%s6325_s12 + $0x88] sm:$0xff] }
 0x40c   : > { %4060 = vmatprep.subr.bf16.mxu0 %v4059_v54 }
 0x40f   : > { %4062 = vmatpush1.bf16.msra.mxu0 %v4061_v58 }
 0x410   : > { %4064 = vmatprep.subr.bf16.mxu0 %v4063_v59 }
 0x413   : > { %4066 = vmatpush1.bf16.msra.mxu0 %v4065_v63  ;;  %v2439_v63 = vld [vmem:[%s6324_s11 + $0x18] sm:$0xff] }
 0x414   : > { %4068 = vmatprep.subr.bf16.mxu0 %v4067_v1  ;;  %v4107_v1 = vpack.c.bf16 %v2439_v63, %v2438_v29  ;;  %v2620_v63 = vld [vmem:[%s6326_s13] sm:$0xff] }
 0x417   : > { %4070 = vmatpush1.bf16.msra.mxu0 %v4069_v4  ;;  %v4110_v4 = vpack.c.bf16 %v2441_v3, %v2440_v2  ;;  %v3548_v2 = vld [vmem:[%s6326_s13 + $0x50] sm:$0xff] }
 0x418   : > { %3510 = vmatprep.subr.msk.mxu0 %vm1157_vm4, %v3509_v5  ;;  %v2442_v5 = vld [vmem:[%s6324_s11 + $0x30] sm:$0xff] }
 0x419   : > { %v4113_v7 = vpack.c.bf16 %v2443_v6, %v2442_v5  ;;  %v2622_v5 = vld [vmem:[%s6326_s13 + $0x10] sm:$0xff]  ;;  %v2623_v6 = vld [vmem:[%s6326_s13 + $0x18] sm:$0xff] }
 0x41b   : > { %3511 = vmatpush1.msk.msra.mxu0 %vm1157_vm4, %v3508_v15  ;;  %v2447_v15 = vld [vmem:[%s6324_s11 + $0x58] sm:$0xff] }
 0x41c   : > { %3512 = vmatmul.mubr.msk.f32.vlgmr.msra.gmra.mrb[8].mxu0 %vm1730_vm9, %v5526_v39  ;;  %4072 = vmatprep.subr.bf16.mxu0 %v4071_v16  ;;  %v3529_v39 = vld [vmem:[%s6320_s7 + $0x338] sm:$0xff]  ;;  %v4119_v16 = vpack.c.bf16 %v2447_v15, %v2446_v14  ;;  %v4167_v14 = vpack.c.bf16 %v3551_v9, %v3550_v8  ;;  %v2624_v15 = vld [vmem:[%s6326_s13 + $0x20] sm:$0xff]  ;;  %v3584_v9 = vld [vmem:[%s6326_s13 + $0x150] sm:$0xff] }
 0x41d   : > { %4074 = vmatpush1.bf16.msra.mxu0 %v4073_v19  ;;  %2128 = vmatprep.mubr.f32.mxu0 %v4696_v0  ;;  %v4083_v22 = vpack.c.bf16 %v3529_v39, %v3527_v12  ;;  %v2448_v19 = vld [vmem:[%s6324_s11 + $0x60] sm:$0xff]  ;;  %v2455_v12 = vld [vmem:[%s6324_s11 + $0x98] sm:$0xff] }
 0x41e   : > { %4076 = vmatprep.subr.bf16.mxu0 %v4075_v10  ;;  %v2449_v10 = vld [vmem:[%s6324_s11 + $0x68] sm:$0xff]  ;;  %v4131_v39 = vpack.c.bf16 %v2455_v12, %v2454_v28  ;;  %v2628_v12 = vld [vmem:[%s6326_s13 + $0x40] sm:$0xff] }
 0x41f   : > { %v4122_v20 = vpack.c.bf16 %v2449_v10, %v2448_v19  ;;  %v3552_v19 = vld [vmem:[%s6326_s13 + $0x70] sm:$0xff]  ;;  %v3553_v10 = vld [vmem:[%s6326_s13 + $0x78] sm:$0xff] }
 0x420   : > { %3513 = vmatmul.mubr.msk.f32.gmra.mrb[10].mxu0 %vm1730_vm9, %v2046_v30  ;;  %v3533_v30 = vld [vmem:[%s6320_s7 + $0x358] sm:$0xff]  ;;  %v4170_v21 = vpack.c.bf16 %v3553_v10, %v3552_v19  ;;  %v3588_v10 = vld [vmem:[%s6326_s13 + $0x170] sm:$0xff] }
 0x421   : > { %4078 = vmatpush1.bf16.msra.mxu0 %v4077_v25  ;;  %2239 = vmatprep.mubr.f32.mxu0 %v4696_v0  ;;  %v4087_v42 = vpack.c.bf16 %v3533_v30, %v3531_v35  ;;  %v2452_v25 = vld [vmem:[%s6324_s11 + $0x80] sm:$0xff] }
 0x422   : > { %4080 = vmatprep.subr.bf16.mxu0 %v4079_v26  ;;  %v2453_v26 = vld [vmem:[%s6324_s11 + $0x88] sm:$0xff] }
 0x423   : > { %v4128_v27 = vpack.c.bf16 %v2453_v26, %v2452_v25  ;;  %v3554_v25 = vld [vmem:[%s6326_s13 + $0x80] sm:$0xff]  ;;  %v3555_v26 = vld [vmem:[%s6326_s13 + $0x88] sm:$0xff] }
 0x424   : > { %v4173_v28 = vpack.c.bf16 %v3555_v26, %v3554_v25 }
 0x425   : > { %4082 = vmatpush1.bf16.msra.mxu0 %v4081_v13 }
 0x426   : > { %4084 = vmatprep.subr.bf16.mxu0 %v4083_v22 }
 0x429   : > { %4086 = vmatpush1.bf16.msra.mxu0 %v4085_v41 }
 0x42a   : > { %4088 = vmatprep.subr.bf16.mxu0 %v4087_v42 }
 0x42d   : > { %4090 = vmatpush1.bf16.msra.mxu0 %v4089_v45  ;;  %v2532_v45 = vld [vmem:[%s6325_s12 + $0x18] sm:$0xff] }
 0x42e   : > { %3536 = vmatprep.subr.msk.mxu0 %vm1157_vm4, %v3535_v46  ;;  %v4137_v46 = vpack.c.bf16 %v2532_v45, %v2531_v44  ;;  %v3561_v44 = vld [vmem:[%s6326_s13 + $0xa8] sm:$0xff] }
 0x431   : > { %3537 = vmatpush1.msk.msra.mxu0 %vm1157_vm4, %v3534_v47  ;;  %v2533_v47 = vld [vmem:[%s6325_s12 + $0x20] sm:$0xff] }
 0x432   : > { %3538 = vmatmul.mubr.msk.f32.vlgmr.msra.gmra.mrb[8].mxu0 %vm1730_vm9, %v5531_v40  ;;  %4163 = vmatprep.subr.bf16.mxu0 %v4698_v18 }
 0x433   : > { %2245 = vmatprep.mubr.f32.mxu0 %v4696_v0 }
 0x436   : > { %3539 = vmatmul.mubr.msk.f32.gmra.mrb[10].mxu0 %vm1730_vm9, %v2163_v31 }
 0x437   : > { %3706 = vmatprep.mubr.msk.f32.mxu0 %vm4699_vm13, %v4696_v0 }
 0x505   : > { %v2241_v50 = vpop.f32.mrb[8].mxu0 }
 0x506   : > { %v2243_v52 = vpop.f32.mrb[9].mxu0  ;;  %v2268_v53 = vadd.f32 %v2261_v49, %v2241_v50  ;;  %v2535_v50 = vld [vmem:[%s6325_s12 + $0x30] sm:$0xff] }
 0x507   : > { %v2269_v54 = vadd.f32 %v2265_v51, %v2243_v52 }
 0x508   : > { %v2272_v37 = vmax.f32 %v2268_v53, 0.0  ;;  %v2537_v53 = vld [vmem:[%s6325_s12 + $0x40] sm:$0xff] }
 0x509   : > { %v2247_v40 = vpop.f32.mrb[10].mxu0  ;;  %v2273_v58 = vmax.f32 %v2269_v54, 0.0  ;;  %v2538_v54 = vld [vmem:[%s6325_s12 + $0x48] sm:$0xff] }
 0x50a   : > { %v2270_v55 = vadd.f32 %v2261_v49, %v2247_v40  ;;  %v2249_v56 = vpop.f32.mrb[11].mxu0  ;;  %v4140_v49 = vpack.c.bf16 %v2534_v48, %v2533_v47  ;;  %v4146_v40 = vpack.c.bf16 %v2538_v54, %v2537_v53  ;;  %v3562_v53 = vld [vmem:[%s6326_s13 + $0xb0] sm:$0xff]  ;;  %v3563_v54 = vld [vmem:[%s6326_s13 + $0xb8] sm:$0xff] }
 0x50b   : > { %v2271_v57 = vadd.f32 %v2265_v51, %v2249_v56  ;;  %v2536_v51 = vld [vmem:[%s6325_s12 + $0x38] sm:$0xff] }
 0x50c   : > { %v2274_v17 = vmax.f32 %v2270_v55, 0.0  ;;  %v4143_v52 = vpack.c.bf16 %v2536_v51, %v2535_v50  ;;  %v2539_v55 = vld [vmem:[%s6325_s12 + $0x50] sm:$0xff]  ;;  %v2540_v56 = vld [vmem:[%s6325_s12 + $0x58] sm:$0xff]  ;;  %v3574_v50 = vld [vmem:[%s6326_s13 + $0x108] sm:$0xff] }
 0x50d   : > { %v2275_v31 = vmax.f32 %v2271_v57, 0.0  ;;  %v4149_v57 = vpack.c.bf16 %v2540_v56, %v2539_v55  ;;  %v3575_v55 = vld [vmem:[%s6326_s13 + $0x110] sm:$0xff]  ;;  %v3576_v56 = vld [vmem:[%s6326_s13 + $0x118] sm:$0xff] }
 0x50e   : > { %v4094_v59 = vpack.c.bf16 %v2274_v17, %v2272_v37  ;;  %v2541_v37 = vld [vmem:[%s6325_s12 + $0x60] sm:$0xff]  ;;  %v2542_v17 = vld [vmem:[%s6325_s12 + $0x68] sm:$0xff] }
 0x50f   : > { %v4091_v36 = vpack.c.bf16 %v2275_v31, %v2273_v58  ;;  %v4152_v58 = vpack.c.bf16 %v2542_v17, %v2541_v37  ;;  %v2543_v31 = vld [vmem:[%s6325_s12 + $0x70] sm:$0xff]  ;;  %v3564_v37 = vld [vmem:[%s6326_s13 + $0xc0] sm:$0xff]  ;;  %v3565_v17 = vld [vmem:[%s6326_s13 + $0xc8] sm:$0xff] }
 0x511   : > { %4093 = vmatprep.subr.msk.bf16.mxu1 %vm4092_vm11, %v4091_v36 }
 0x512   : > { %4096 = vmatpush1.bf16.msk.msra.mxu1 %vm4092_vm11, %v4094_v59 }
 0x513   : > { %4099 = vmatprep.subr.msk.bf16.mxu1 %vm4092_vm11, %v4091_v36 }
 0x515   : > { %3542 = vmatmul.mubr.msk.f32.vlgmr.msra.gmra.mrb[20].mxu1 %vm2277_vm12, %v2276_v33  ;;  %v2545_v33 = vld [vmem:[%s6325_s12 + $0x80] sm:$0xff] }
 0x516   : > { %4102 = vmatpush1.bf16.msk.msra.mxu1 %vm4092_vm11, %v4094_v59  ;;  %2427 = vmatprep.mubr.f32.mxu1 %v4696_v0  ;;  %v2544_v59 = vld [vmem:[%s6325_s12 + $0x78] sm:$0xff]  ;;  %v4158_v60 = vpack.c.bf16 %v2546_v38, %v2545_v33  ;;  %v3566_v33 = vld [vmem:[%s6326_s13 + $0xd0] sm:$0xff] }
 0x517   : > { %4103 = vmatprep.subr.bf16.mxu1 %v4698_v18  ;;  %v4155_v36 = vpack.c.bf16 %v2544_v59, %v2543_v31  ;;  %v3577_v31 = vld [vmem:[%s6326_s13 + $0x120] sm:$0xff]  ;;  %v3578_v59 = vld [vmem:[%s6326_s13 + $0x128] sm:$0xff]  ;;  %v3567_v38 = vld [vmem:[%s6326_s13 + $0xd8] sm:$0xff] }
 0x519   : > { %3545 = vmatmul.mubr.msk.f32.vlgmr.msra.gmra.mrb[22].mxu1 %vm2277_vm12, %v2359_v61  ;;  %v2547_v61 = vld [vmem:[%s6325_s12 + $0x90] sm:$0xff] }
 0x51a   : > { %4105 = vmatpush1.bf16.msra.mxu1 %v4104_v62  ;;  %v2548_v62 = vld [vmem:[%s6325_s12 + $0x98] sm:$0xff] }
 0x51b   : > { %4106 = vmatprep.subr.bf16.mxu1 %v4698_v18  ;;  %v4161_v29 = vpack.c.bf16 %v2548_v62, %v2547_v61  ;;  %v3579_v61 = vld [vmem:[%s6326_s13 + $0x130] sm:$0xff]  ;;  %v3580_v62 = vld [vmem:[%s6326_s13 + $0x138] sm:$0xff] }
 0x51e   : > { %4108 = vmatpush1.bf16.msra.mxu1 %v4107_v1  ;;  %v2621_v1 = vld [vmem:[%s6326_s13 + $0x8] sm:$0xff] }
 0x51f   : > { %4109 = vmatprep.subr.bf16.mxu1 %v4698_v18  ;;  %v4179_v3 = vpack.c.bf16 %v2621_v1, %v2620_v63  ;;  %v3568_v63 = vld [vmem:[%s6326_s13 + $0xe0] sm:$0xff]  ;;  %v3569_v1 = vld [vmem:[%s6326_s13 + $0xe8] sm:$0xff] }
 0x522   : > { %4111 = vmatpush1.bf16.msra.mxu1 %v4110_v4  ;;  %v3549_v4 = vld [vmem:[%s6326_s13 + $0x58] sm:$0xff] }
 0x523   : > { %4112 = vmatprep.subr.bf16.mxu1 %v4698_v18 }
 0x526   : > { %4114 = vmatpush1.bf16.msra.mxu1 %v4113_v7  ;;  %v4164_v7 = vpack.c.bf16 %v3549_v4, %v3548_v2  ;;  %v4221_v2 = vpack.c.bf16 %v3580_v62, %v3579_v61  ;;  %v3582_v4 = vld [vmem:[%s6326_s13 + $0x140] sm:$0xff]  ;;  %v3144_v62 = vld [vmem:[%s6330_s17 + $0x50] sm:$0xff] }
 0x527   : > { %4115 = vmatprep.subr.bf16.mxu1 %v4698_v18 }
 0x528   : > { %4165 = vmatpush3.bf16.msra.mxu0 %v4164_v7 }
 0x529   : > { %4166 = vmatprep.subr.bf16.mxu0 %v4698_v18 }
 0x52a   : > { %4117 = vmatpush1.bf16.msra.mxu1 %v4116_v11  ;;  %v4182_v11 = vpack.c.bf16 %v2623_v6, %v2622_v5  ;;  %v3583_v5 = vld [vmem:[%s6326_s13 + $0x148] sm:$0xff] }
 0x52b   : > { %4118 = vmatprep.subr.bf16.mxu1 %v4698_v18  ;;  %v4224_v7 = vpack.c.bf16 %v3583_v5, %v3582_v4 }
 0x52c   : > { %4168 = vmatpush3.bf16.msra.mxu0 %v4167_v14 }
 0x52d   : > { %4169 = vmatprep.subr.bf16.mxu0 %v4698_v18 }
 0x52e   : > { %4120 = vmatpush1.bf16.msra.mxu1 %v4119_v16  ;;  %v2625_v16 = vld [vmem:[%s6326_s13 + $0x28] sm:$0xff] }
 0x52f   : > { %4121 = vmatprep.subr.bf16.mxu1 %v4698_v18 }
 0x530   : > { %4171 = vmatpush3.bf16.msra.mxu0 %v4170_v21 }
 0x531   : > { %4172 = vmatprep.subr.bf16.mxu0 %v4698_v18 }
 0x532   : > { %4123 = vmatpush1.bf16.msra.mxu1 %v4122_v20  ;;  %v4185_v20 = vpack.c.bf16 %v2625_v16, %v2624_v15  ;;  %v3586_v15 = vld [vmem:[%s6326_s13 + $0x160] sm:$0xff]  ;;  %v3587_v16 = vld [vmem:[%s6326_s13 + $0x168] sm:$0xff] }
 0x533   : > { %4124 = vmatprep.subr.bf16.mxu1 %v4698_v18  ;;  %v4230_v19 = vpack.c.bf16 %v3587_v16, %v3586_v15 }
 0x534   : > { %4174 = vmatpush3.bf16.msra.mxu0 %v4173_v28  ;;  %v3047_v28 = vld [vmem:[%s6328_s15 + $0x8] sm:$0xff] }
 0x535   : > { %4175 = vmatprep.subr.bf16.mxu0 %v4698_v18 }
 0x536   : > { %4126 = vmatpush1.bf16.msra.mxu1 %v4125_v24  ;;  %v2627_v24 = vld [vmem:[%s6326_s13 + $0x38] sm:$0xff] }
 0x537   : > { %4127 = vmatprep.subr.bf16.mxu1 %v4698_v18 }
 0x53a   : > { %4129 = vmatpush1.bf16.msra.mxu1 %v4128_v27  ;;  %v4188_v27 = vpack.c.bf16 %v2627_v24, %v2626_v23  ;;  %v3590_v23 = vld [vmem:[%s6326_s13 + $0x180] sm:$0xff]  ;;  %v3591_v24 = vld [vmem:[%s6326_s13 + $0x188] sm:$0xff] }
 0x53b   : > { %4130 = vmatprep.subr.bf16.mxu1 %v4698_v18  ;;  %v4236_v25 = vpack.c.bf16 %v3591_v24, %v3590_v23 }
 0x53e   : > { %4132 = vmatpush1.bf16.msra.mxu1 %v4131_v39  ;;  %v2629_v39 = vld [vmem:[%s6326_s13 + $0x48] sm:$0xff] }
 0x53f   : > { %4133 = vmatprep.subr.bf16.mxu1 %v4698_v18 }
 0x5e8   : > { %v2354_v13 = vpop.f32.mrb[20].mxu1 }
 0x5e9   : > { %v2356_v22 = vpop.f32.mrb[21].mxu1 }
 0x5ec   : > { %v2429_v35 = vpop.f32.mrb[22].mxu1 }
 0x5ed   : > { %v2434_v30 = vmax.f32 %v2354_v13, %v2429_v35  ;;  %v2431_v41 = vpop.f32.mrb[23].mxu1  ;;  %v4191_v13 = vpack.c.bf16 %v2629_v39, %v2628_v12  ;;  %v3048_v39 = vld [vmem:[%s6328_s15 + $0x10] sm:$0xff] }
 0x5ee   : > { %v2435_v42 = vmax.f32 %v2356_v22, %v2431_v41  ;;  %v3556_v22 = vld [vmem:[%s6326_s13 + $0x90] sm:$0xff] }
 0x5ef   : > { %v4176_v34 = vpack.c.bf16 %v3557_v32, %v3556_v22  ;;  %v3571_v41 = vld [vmem:[%s6326_s13 + $0xf0] sm:$0xff]  ;;  %v3050_v22 = vld [vmem:[%s6328_s15 + $0x20] sm:$0xff]  ;;  %v3051_v32 = vld [vmem:[%s6328_s15 + $0x28] sm:$0xff] }
 0x5f0   : > { %3546 = vmatprep.mubr.msk.f32.mxu1 %vm709_vm1, %v2435_v42 }
 0x5f1   : > { %2524 = vmatmul.mubr.f32.vlgmr.msra.gmra.mrb[24].mxu1 %v2434_v30  ;;  %4177 = vmatpush3.bf16.msra.mxu0 %v4176_v34  ;;  %v3052_v34 = vld [vmem:[%s6328_s15 + $0x30] sm:$0xff] }
 0x5f2   : > { %4135 = vmatpush1.bf16.msra.mxu1 %v4134_v43  ;;  %3547 = vmatprep.mubr.msk.f32.mxu1 %vm709_vm1, %v2435_v42  ;;  %v3572_v42 = vld [vmem:[%s6326_s13 + $0xf8] sm:$0xff]  ;;  %v3560_v43 = vld [vmem:[%s6326_s13 + $0xa0] sm:$0xff] }
 0x5f3   : > { %4136 = vmatprep.subr.bf16.mxu1 %v4698_v18  ;;  %4193 = vmatprep.subr.bf16.mxu0 %v4698_v18  ;;  %v4194_v51 = vpack.c.bf16 %v3561_v44, %v3560_v43  ;;  %v3055_v43 = vld [vmem:[%s6328_s15 + $0x48] sm:$0xff] }
 0x5f6   : > { %4138 = vmatpush1.bf16.msra.mxu1 %v4137_v46  ;;  %v4209_v46 = vpack.c.bf16 %v3572_v42, %v3571_v41  ;;  %v3054_v42 = vld [vmem:[%s6328_s15 + $0x40] sm:$0xff] }
 0x5f7   : > { %4139 = vmatprep.subr.bf16.mxu1 %v4698_v18  ;;  %v4251_v44 = vpack.c.bf16 %v3055_v43, %v3054_v42 }
 0x5fa   : > { %4141 = vmatpush1.bf16.msra.mxu1 %v4140_v49  ;;  %v3573_v49 = vld [vmem:[%s6326_s13 + $0x100] sm:$0xff] }
 0x5fb   : > { %4142 = vmatprep.subr.bf16.mxu1 %v4698_v18 }
 0x5fe   : > { %4144 = vmatpush1.bf16.msra.mxu1 %v4143_v52 }
 0x5ff   : > { %4145 = vmatprep.subr.bf16.mxu1 %v4698_v18 }
 0x602   : > { %4147 = vmatpush1.bf16.msra.mxu1 %v4146_v40  ;;  %v4212_v40 = vpack.c.bf16 %v3574_v50, %v3573_v49  ;;  %v3059_v49 = vld [vmem:[%s6328_s15 + $0x68] sm:$0xff] }
 0x603   : > { %4148 = vmatprep.subr.bf16.mxu1 %v4698_v18 }
 0x606   : > { %4150 = vmatpush1.bf16.msra.mxu1 %v4149_v57  ;;  %v4197_v57 = vpack.c.bf16 %v3563_v54, %v3562_v53  ;;  %v3134_v54 = vld [vmem:[%s6330_s17] sm:$0xff] }
 0x607   : > { %4151 = vmatprep.subr.bf16.mxu1 %v4698_v18 }
 0x60a   : > { %4153 = vmatpush1.bf16.msra.mxu1 %v4152_v58  ;;  %v4215_v58 = vpack.c.bf16 %v3576_v56, %v3575_v55  ;;  %v3136_v55 = vld [vmem:[%s6330_s17 + $0x10] sm:$0xff] }
 0x60b   : > { %4154 = vmatprep.subr.bf16.mxu1 %v4698_v18 }
 0x60e   : > { %4156 = vmatpush1.bf16.msra.mxu1 %v4155_v36  ;;  %v4200_v36 = vpack.c.bf16 %v3565_v17, %v3564_v37  ;;  %v3138_v17 = vld [vmem:[%s6330_s17 + $0x20] sm:$0xff] }
 0x60f   : > { %4157 = vmatprep.subr.bf16.mxu1 %v4698_v18 }
 0x612   : > { %4159 = vmatpush1.bf16.msra.mxu1 %v4158_v60  ;;  %v4218_v60 = vpack.c.bf16 %v3578_v59, %v3577_v31  ;;  %v3140_v59 = vld [vmem:[%s6330_s17 + $0x30] sm:$0xff] }
 0x613   : > { %4160 = vmatprep.subr.bf16.mxu1 %v4698_v18 }
 0x616   : > { %4162 = vmatpush1.bf16.msra.mxu1 %v4161_v29  ;;  %v4203_v29 = vpack.c.bf16 %v3567_v38, %v3566_v33  ;;  %v3142_v38 = vld [vmem:[%s6330_s17 + $0x40] sm:$0xff] }
 0x617   : > { %4178 = vmatprep.subr.bf16.mxu1 %v4698_v18 }
 0x619   : > { %2614 = vmatmul.mubr.f32.vlgmr.msra.gmra.mrb[26].mxu1 %v2434_v30 }
 0x61a   : > { %4180 = vmatpush3.bf16.msra.mxu1 %v4179_v3  ;;  %3729 = vmatprep.mubr.msk.f32.mxu1 %vm4699_vm13, %v4696_v0  ;;  %v4206_v3 = vpack.c.bf16 %v3569_v1, %v3568_v63  ;;  %v3146_v1 = vld [vmem:[%s6330_s17 + $0x60] sm:$0xff] }
 0x61b   : > { %4181 = vmatprep.subr.bf16.mxu1 %v4698_v18 }
 0x61e   : > { %4183 = vmatpush3.bf16.msra.mxu1 %v4182_v11  ;;  %v3585_v11 = vld [vmem:[%s6326_s13 + $0x158] sm:$0xff] }
 0x61f   : > { %4184 = vmatprep.subr.bf16.mxu1 %v4698_v18  ;;  %v4227_v14 = vpack.c.bf16 %v3585_v11, %v3584_v9 }
 0x622   : > { %4186 = vmatpush3.bf16.msra.mxu1 %v4185_v20  ;;  %v3589_v20 = vld [vmem:[%s6326_s13 + $0x178] sm:$0xff] }
 0x623   : > { %4187 = vmatprep.subr.bf16.mxu1 %v4698_v18  ;;  %v4233_v21 = vpack.c.bf16 %v3589_v20, %v3588_v10  ;;  %v3043_v20 = vld [vmem:[#allocation8] sm:$0x1] }
 0x626   : > { %4189 = vmatpush3.bf16.msra.mxu1 %v4188_v27  ;;  %v3046_v27 = vld [vmem:[%s6328_s15] sm:$0xff] }
 0x627   : > { %4190 = vmatprep.subr.bf16.mxu1 %v4698_v18  ;;  %v4239_v12 = vpack.c.bf16 %v3047_v28, %v3046_v27  ;;  %v3062_v28 = vld [vmem:[#allocation10] sm:$0x1] }
 0x62a   : > { %4192 = vmatpush3.bf16.msra.mxu1 %v4191_v13 }
 0x62b   : > { %4208 = vmatprep.subr.bf16.mxu1 %v4698_v18 }
 0x6c4   : > { %v2525_v35 = vpop.f32.mrb[24].mxu1 }
 0x6c5   : > { %v2527_v30 = vpop.f32.mrb[25].mxu1 }
 0x6c6   : > { %v3053_v30 = vld [vmem:[%s6328_s15 + $0x38] sm:$0xff] }
 0x6c7   : > { %v4248_v41 = vpack.c.bf16 %v3053_v30, %v3052_v34 }
 0x6ec   : > { %v2615_v45 = vpop.f32.mrb[26].mxu1 }
 0x6ed   : > { %v6041_v47 = vmax.f32 %v2525_v35, %v2615_v45  ;;  %v2617_v48 = vpop.f32.mrb[27].mxu1  ;;  %v4245_v35 = vpack.c.bf16 %v3051_v32, %v3050_v22  ;;  %v3056_v45 = vld [vmem:[%s6328_s15 + $0x50] sm:$0xff] }
 0x6ee   : > { %v3058_v48 = vld [vmem:[%s6328_s15 + $0x60] sm:$0xff]  ;;  %v3150_v22 = vld [vmem:[#allocation11] sm:$0x1] }
 0x6ef   : > { %v2642_v52 = vrot.slane %v6041_v47, 1  ;;  %3730 = vmatmul.mubr.msk.f32.vlgmr.msra.gmra.mrb[28].mxu1 %vm2643_vm14, %v6041_v47  ;;  %v2884_v6 = vrot.slane %v6041_v47, 3  ;;  %v2799_v8 = vrot.slane %v6041_v47, 2  ;;  %v2969_v26 = vrot.slane %v6041_v47, 4 }
 0x6f0   : > { %4210 = vmatpush3.bf16.msra.mxu1 %v4209_v46  ;;  %3775 = vmatprep.mubr.msk.f32.mxu1 %vm4699_vm13, %v4696_v0  ;;  %v3057_v46 = vld [vmem:[%s6328_s15 + $0x58] sm:$0xff]  ;;  %v4257_v50 = vpack.c.bf16 %v3059_v49, %v3058_v48 }
 0x6f1   : > { %3707 = vmatmul.mubr.msk.f32.vlgmr.msra.gmra.mrb[12].mxu0 %vm2643_vm14, %v2642_v52  ;;  %4211 = vmatprep.subr.bf16.mxu1 %v4698_v18  ;;  %v4254_v47 = vpack.c.bf16 %v3057_v46, %v3056_v45  ;;  %v3061_v52 = vld [vmem:[%s6328_s15 + $0x78] sm:$0xff] }
 0x6f2   : > { %4195 = vmatpush3.bf16.msra.mxu0 %v4194_v51  ;;  %3752 = vmatprep.mubr.msk.f32.mxu0 %vm4699_vm13, %v4696_v0  ;;  %v3060_v51 = vld [vmem:[%s6328_s15 + $0x70] sm:$0xff] }
 0x6f3   : > { %4196 = vmatprep.subr.bf16.mxu0 %v4698_v18  ;;  %v4260_v53 = vpack.c.bf16 %v3061_v52, %v3060_v51 }
 0x6f4   : > { %4213 = vmatpush3.bf16.msra.mxu1 %v4212_v40  ;;  %v3135_v40 = vld [vmem:[%s6330_s17 + $0x8] sm:$0xff] }
 0x6f5   : > { %4214 = vmatprep.subr.bf16.mxu1 %v4698_v18  ;;  %v4263_v56 = vpack.c.bf16 %v3135_v40, %v3134_v54 }
 0x6f6   : > { %4198 = vmatpush3.bf16.msra.mxu0 %v4197_v57  ;;  %v3137_v57 = vld [vmem:[%s6330_s17 + $0x18] sm:$0xff] }
 0x6f7   : > { %4199 = vmatprep.subr.bf16.mxu0 %v4698_v18  ;;  %v4266_v37 = vpack.c.bf16 %v3137_v57, %v3136_v55 }
 0x6f8   : > { %4216 = vmatpush3.bf16.msra.mxu1 %v4215_v58  ;;  %v3139_v58 = vld [vmem:[%s6330_s17 + $0x28] sm:$0xff] }
 0x6f9   : > { %4217 = vmatprep.subr.bf16.mxu1 %v4698_v18  ;;  %v4269_v31 = vpack.c.bf16 %v3139_v58, %v3138_v17 }
 0x6fa   : > { %4201 = vmatpush3.bf16.msra.mxu0 %v4200_v36  ;;  %v3141_v36 = vld [vmem:[%s6330_s17 + $0x38] sm:$0xff] }
 0x6fb   : > { %4202 = vmatprep.subr.bf16.mxu0 %v4698_v18  ;;  %v4272_v33 = vpack.c.bf16 %v3141_v36, %v3140_v59 }
 0x6fc   : > { %4219 = vmatpush3.bf16.msra.mxu1 %v4218_v60  ;;  %v3143_v60 = vld [vmem:[%s6330_s17 + $0x48] sm:$0xff] }
 0x6fd   : > { %4220 = vmatprep.subr.bf16.mxu1 %v4698_v18  ;;  %v4275_v61 = vpack.c.bf16 %v3143_v60, %v3142_v38 }
 0x6fe   : > { %4204 = vmatpush3.bf16.msra.mxu0 %v4203_v29  ;;  %v3145_v29 = vld [vmem:[%s6330_s17 + $0x58] sm:$0xff] }
 0x6ff   : > { %4205 = vmatprep.subr.bf16.mxu0 %v4698_v18  ;;  %v4278_v63 = vpack.c.bf16 %v3145_v29, %v3144_v62 }
 0x700   : > { %4222 = vmatpush3.bf16.msra.mxu1 %v4221_v2  ;;  %v3147_v2 = vld [vmem:[%s6330_s17 + $0x68] sm:$0xff] }
 0x701   : > { %4238 = vmatprep.subr.bf16.mxu1 %v4698_v18 }
 0x702   : > { %4207 = vmatpush3.bf16.msra.mxu0 %v4206_v3  ;;  %v4281_v3 = vpack.c.bf16 %v3147_v2, %v3146_v1 }
 0x703   : > { %3776 = vmatmul.mubr.msk.f32.vlgmr.msra.gmra.mrb[30].mxu1 %vm2643_vm14, %v2884_v6  ;;  %4223 = vmatprep.subr.bf16.mxu0 %v4698_v18 }
 0x704   : > { %3833 = vmatprep.mubr.msk.f32.mxu1 %vm4699_vm13, %v4696_v0  ;;  %4240 = vmatpush3.bf16.msra.mxu1 %v4239_v12 }
 0x705   : > { %3753 = vmatmul.mubr.msk.f32.vlgmr.msra.gmra.mrb[14].mxu0 %vm2643_vm14, %v2799_v8  ;;  %4241 = vmatprep.subr.bf16.mxu1 %v4698_v18 }
 0x706   : > { %4225 = vmatpush3.bf16.msra.mxu0 %v4224_v7  ;;  %3798 = vmatprep.mubr.msk.f32.mxu0 %vm4699_vm13, %v4696_v0 }
 0x707   : > { %4226 = vmatprep.subr.bf16.mxu0 %v4698_v18 }
 0x70a   : > { %4228 = vmatpush3.bf16.msra.mxu0 %v4227_v14 }
 0x70b   : > { %4229 = vmatprep.subr.bf16.mxu0 %v4698_v18 }
 0x70e   : > { %4231 = vmatpush3.bf16.msra.mxu0 %v4230_v19 }
 0x70f   : > { %4232 = vmatprep.subr.bf16.mxu0 %v4698_v18 }
 0x712   : > { %4234 = vmatpush3.bf16.msra.mxu0 %v4233_v21 }
 0x713   : > { %4235 = vmatprep.subr.bf16.mxu0 %v4698_v18 }
 0x716   : > { %4237 = vmatpush3.bf16.msra.mxu0 %v4236_v25 }
 0x717   : > { %4262 = vmatprep.subr.bf16.mxu0 %v4698_v18 }
 0x719   : > { %3799 = vmatmul.mubr.msk.f32.vlgmr.msra.gmra.mrb[16].mxu0 %vm2643_vm14, %v2969_v26  ;;  %v3149_v26 = vld [vmem:[%s6330_s17 + $0x78] sm:$0xff] }
 0x71a   : > { %3868 = vmatprep.mubr.msk.f32.mxu0 %vm4699_vm13, %v4696_v0  ;;  %v3049_v0 = vld [vmem:[%s6328_s15 + $0x18] sm:$0xff]  ;;  %4264 = vmatpush3.bf16.msra.mxu0 %v4263_v56 }
 0x71b   : > { %v4242_v13 = vpack.c.bf16 %v3049_v0, %v3048_v39  ;;  %4265 = vmatprep.subr.bf16.mxu0 %v4698_v18 }
 0x71d   : > { %4243 = vmatpush3.bf16.msra.mxu1 %v4242_v13 }
 0x71e   : > { %4244 = vmatprep.subr.bf16.mxu1 %v4698_v18  ;;  %4267 = vmatpush3.bf16.msra.mxu0 %v4266_v37 }
 0x71f   : > { %4268 = vmatprep.subr.bf16.mxu0 %v4698_v18 }
 0x721   : > { %4246 = vmatpush3.bf16.msra.mxu1 %v4245_v35 }
 0x722   : > { %4247 = vmatprep.subr.bf16.mxu1 %v4698_v18  ;;  %4270 = vmatpush3.bf16.msra.mxu0 %v4269_v31 }
 0x723   : > { %4271 = vmatprep.subr.bf16.mxu0 %v4698_v18 }
 0x725   : > { %4249 = vmatpush3.bf16.msra.mxu1 %v4248_v41 }
 0x726   : > { %4250 = vmatprep.subr.bf16.mxu1 %v4698_v18  ;;  %4273 = vmatpush3.bf16.msra.mxu0 %v4272_v33 }
 0x727   : > { %4274 = vmatprep.subr.bf16.mxu0 %v4698_v18 }
 0x729   : > { %4252 = vmatpush3.bf16.msra.mxu1 %v4251_v44 }
 0x72a   : > { %4253 = vmatprep.subr.bf16.mxu1 %v4698_v18  ;;  %4276 = vmatpush3.bf16.msra.mxu0 %v4275_v61 }
 0x72b   : > { %4277 = vmatprep.subr.bf16.mxu0 %v4698_v18 }
 0x72d   : > { %4255 = vmatpush3.bf16.msra.mxu1 %v4254_v47 }
 0x72e   : > { %4256 = vmatprep.subr.bf16.mxu1 %v4698_v18  ;;  %4279 = vmatpush3.bf16.msra.mxu0 %v4278_v63 }
 0x72f   : > { %4280 = vmatprep.subr.bf16.mxu0 %v4698_v18 }
 0x731   : > { %4258 = vmatpush3.bf16.msra.mxu1 %v4257_v50 }
 0x732   : > { %4259 = vmatprep.subr.bf16.mxu1 %v4698_v18  ;;  %4282 = vmatpush3.bf16.msra.mxu0 %v4281_v3 }
 0x733   : > { %4283 = vmatprep.subr.bf16.mxu0 %v4698_v18  ;;  %v3148_v18 = vld [vmem:[%s6330_s17 + $0x70] sm:$0xff] }
 0x734   : > { %v4284_v27 = vpack.c.bf16 %v3149_v26, %v3148_v18 }
 0x735   : > { %4261 = vmatpush3.bf16.msra.mxu1 %v4260_v53 }
 0x736   : > { %4285 = vmatpush3.bf16.msra.mxu0 %v4284_v27 }
 0x7c2   : > { %v2784_v4 = vpop.f32.mrb[28].mxu1 }
 0x7c3   : > { %v3731_v5 = vpop.f32.mrb[29].mxu1 }
 0x7c4   : > { %v2712_v6 = vpop.f32.mrb[12].mxu0 }
 0x7c5   : > { %v2785_v7 = vadd.f32 %v2784_v4, %v2712_v6  ;;  %v3708_v8 = vpop.f32.mrb[13].mxu0 }
 0x7d6   : > { %v2953_v9 = vpop.f32.mrb[30].mxu1 }
 0x7d7   : > { %v3777_v11 = vpop.f32.mrb[31].mxu1 }
 0x7d8   : > { %v2868_v14 = vpop.f32.mrb[14].mxu0 }
 0x7d9   : > { %v2872_v15 = vadd.f32 %v2868_v14, %v2785_v7  ;;  %v3754_v16 = vpop.f32.mrb[15].mxu0 }
 0x7db   : > { %v2957_v19 = vadd.f32 %v2953_v9, %v2872_v15 }
 0x7ec   : > { %v3038_v10 = vpop.f32.mrb[16].mxu0 }
 0x7ed   : > { %v3042_v21 = vadd.f32 %v3038_v10, %v2957_v19  ;;  %v3800_v23 = vpop.f32.mrb[17].mxu0 }
 0x7ef   : > { %v3044_v24 = vadd.f32 %v3043_v20, %v3042_v21 }
 0x7f1   : > { %v3045_v25 = vmax.f32 %v3044_v24, 0.0 }
 0x7f3   : > { %3834 = vmatmul.mubr.f32.vlgmr.msra.gmra.mrb[32].mxu1 %v3045_v25 }
 0x8c6   : > { %v3129_v12 = vpop.f32.mrb[32].mxu1 }
 0x8c7   : > { %v3130_v39 = vadd.f32 %v3129_v12, %v3062_v28  ;;  %v3835_v0 = vpop.f32.mrb[33].mxu1 }
 0x8c9   : > { %v3133_v13 = vmax.f32 %v3130_v39, 0.0 }
 0x8cb   : > { %3869 = vmatmul.mubr.f32.vlgmr.msra.gmra.mrb[18].mxu0 %v3133_v13 }
 0x99e   : > { %v3217_v32 = vpop.f32.mrb[18].mxu0 }
 0x99f   : > { %v3218_v34 = vadd.f32 %v3217_v32, %v3150_v22  ;;  %v3870_v35 = vpop.f32.mrb[19].mxu0 }
 0x9a1   : > { %3221 = vst [vmem:[%s670_s24] sm:$0x1] %v3218_v34 }
 0x9a2   : > { %4623 = shalt.err (!%p4620_p6)
}
 0x9a3   : > { %s4624_s21 = scalar_lea.hbm %s6271_s25, 16  ;;  %s4628_s24 = scalar_lea.hbm %s6383_s28, 32 }
 0x9a4   : > { %p4625_p5 = scmp.ne.s32.totalorder %s6271_s25, %s4624_s21  ;;  %p4629_p10 = scmp.lt.u32.totalorder %s6271_s25, %s6383_s28 }
 0x9a5   : > { %p4630_p2 = scmp.lt.u32.totalorder %s4628_s24, %s4624_s21  ;;  %p4632_p4 = scmp.lt.u32.totalorder %s4624_s21, %s6271_s25 }
 0x9a6   : > { %p4626_p9 = pnand %p4625_p5, %p6384_p7 }
 0x9a7   : > { %p4631_p3 = por %p4630_p2, %p4629_p10 }
 0x9a8   : > { %p4627_p12 = pneg %p4626_p9 }
 0x9a9   : > { %p4633_p8 = por %p4632_p4, %p4631_p3 }
 0x9ab   : > { %p4634_p11 = pnand %p4633_p8, %p4627_p12 }
 0x9ad   : > { %4637 = shalt.err (!%p4634_p11)
}
 0x9ae   : > { %4362 = dma.vmem_to_hbm [thread:$0]  (%p6384_p7), %s6273_s22, 16, %s6271_s25, %s3223_s23  }
 0x9af PF: > { %s6385_s29 = sld [smem:[#allocation22_spill]]  ;;  %s6386_s1 = sld [smem:[#allocation19_spill]] }
 0x9b0   : > { %s6387_s3 = sld [smem:[#allocation26_spill]] }
 0x9b5   : > { %p4399_p13 = scmp.ge.s32.totalorder %s6385_s29, 2  ;;  %s3247_s26 = sand.u32 1, %s6386_s1  }
 0x9b6   : > { %p6388_p1 = scmp.ne.s32.totalorder %s6387_s3, 0  ;;  %s3248_s30 = scalar_lea.sflag [#allocation4], %s3247_s26 }
 0x9b8   : > { %p4384_p0 = pnand %p4399_p13, %p6388_p1 }
 0x9ba   : > { %4671 = dma.done.wait (!%p4384_p0), %s3248_s30, 16  }
 0x9bb   : > { %4673 = vsyncadd (!%p4384_p0), %s3248_s30, 4294967280  ;;  %s6389_s21 = sld [smem:[#allocation23_spill]]  ;;  %s6390_s0 = sld [smem:[#allocation20_spill]] }
 0x9bc   : > { %s6391_s30 = sld [smem:[#allocation21_spill]]  ;;  %s6392_s20 = sld [smem:[#allocation24_spill]] }
 0x9c1   : > { %p33_p6 = scmp.ge.s32.totalorder %s6389_s21, 4  }
 0x9c3   :  { %35 = sbr.rel (!%p33_p6) target bundleno = 14 (0xe), region = 168 }
 0x9ca   :  { %3252 = vsyncpa [#allocation3], 1 }
 0x9cb   :  { %3254 = vsyncpa [#allocation3 + $0x1], 1 }
 0x9cc   :  { %3255 = vsyncpa [#allocation6], 1 }
 0x9cd   :  { %3256 = vsyncpa [#allocation9], 1 }
 0x9ce   :  { %3257 = vsyncpa [#allocation12], 1 }
 0x9cf   :  { %3258 = vsyncpa [#allocation4], 1 }
 0x9d0   :  { %3260 = vsyncpa [#allocation4 + $0x1], 1 }

</bundles_post_ra>
